<compile_context>
chip_gen: v5e
topology: v5e:2x2
jax: 0.10.0
libtpu: 0.0.40
codegen_flags: <defaults>
</compile_context>

<pallas_src>
import functools

import jax
import jax.numpy as jnp
from jax.experimental import pallas as pl
from jax.experimental.pallas import tpu as pltpu


# ----------------------------------------------------------------------------
# Tiling helper: largest `align`-aligned divisor of `dim` that is <= target,
# else the full dim (full-extent blocks are always legal).
# ----------------------------------------------------------------------------
def _pick_tile(dim, target, align):
    if dim <= target:
        return dim
    t = (target // align) * align
    while t >= align:
        if dim % t == 0:
            return t
        t -= align
    return dim


def _gelu_new(x):
    # GPT-2 "gelu_new" (tanh approximation), computed in f32.
    return 0.5 * x * (1.0 + jnp.tanh(0.7978845608028654 * (x + 0.044715 * x * x * x)))


# ----------------------------------------------------------------------------
# Kernel 1: fused RevIN normalization + 'b l m -> b m l' rearrange +
#           nn.Linear(seq_len, d_model).
#   means = mean(x, 1); stdev = sqrt(var(x, 1, unbiased=False) + 1e-5)
#   out1[b] = ((x[b]-mean)/stdev)^T @ W + bias            (M, d_model) bf16
# The transpose is folded into the matmul (contraction over the time axis),
# so the output store is lane-dense in d_model.  Grid over B (parallel).
# ----------------------------------------------------------------------------
def _revin_linear_kernel(x_ref, w_ref, b_ref, o_ref, mean_ref, std_ref):
    x = x_ref[...]                                     # (L, M) f32
    mean = jnp.mean(x, axis=0, keepdims=True)          # (1, M)
    xc = x - mean
    var = jnp.mean(xc * xc, axis=0, keepdims=True)     # unbiased=False
    xn = (xc * jax.lax.rsqrt(var + 1e-5)).astype(jnp.bfloat16)   # (L, M)
    # (normalized x)^T @ W: contract the time axis of both operands — the
    # 'b l m -> b m l' rearrange lives in the MXU feed, never in HBM.
    y = jax.lax.dot_general(xn, w_ref[...], (((0,), (0,)), ((), ())),
                            preferred_element_type=jnp.float32)   # (M, d_model)
    o_ref[...] = (y + b_ref[...]).astype(o_ref.dtype)
    mean_ref[...] = mean
    std_ref[...] = jnp.sqrt(var + 1e-5)


def revin_linear(x, w, b):
    B, L, M = x.shape
    Dm = w.shape[1]
    return pl.pallas_call(
        _revin_linear_kernel,
        out_shape=(
            jax.ShapeDtypeStruct((B, M, Dm), jnp.bfloat16),
            jax.ShapeDtypeStruct((B, 1, M), jnp.float32),
            jax.ShapeDtypeStruct((B, 1, M), jnp.float32),
        ),
        grid=(B,),
        in_specs=[
            pl.BlockSpec((None, L, M), lambda bi: (bi, 0, 0)),
            pl.BlockSpec((L, Dm), lambda bi: (0, 0)),
            pl.BlockSpec((1, Dm), lambda bi: (0, 0)),
        ],
        out_specs=(
            pl.BlockSpec((None, M, Dm), lambda bi: (bi, 0, 0)),
            pl.BlockSpec((None, 1, M), lambda bi: (bi, 0, 0)),
            pl.BlockSpec((None, 1, M), lambda bi: (bi, 0, 0)),
        ),
        compiler_params=pltpu.CompilerParams(dimension_semantics=("parallel",)),
    )(x, w, b.reshape(1, Dm).astype(jnp.float32))


# ----------------------------------------------------------------------------
# Kernel 2: fused tiled matmul
#   y = epilogue(prologue(x) @ W)  with optional prologue input-add / LayerNorm
#   and optional epilogue bias / gelu_new / residual / row scale-shift.
# Full-K single-step blocks when K fits (no reduction axis); otherwise a
# K-tiled grid with f32 VMEM accumulator and pl.when init/flush.
# ----------------------------------------------------------------------------
def _make_linear_kernel(has_add, has_ln, has_bias, activation, has_res, has_ss,
                        single_k):
    def kernel(*refs):
        it = iter(refs)
        x_ref = next(it)
        add_ref = next(it) if has_add else None
        w_ref = next(it)
        ln_g_ref = next(it) if has_ln else None
        ln_b_ref = next(it) if has_ln else None
        b_ref = next(it) if has_bias else None
        res_ref = next(it) if has_res else None
        scale_ref = next(it) if has_ss else None
        shift_ref = next(it) if has_ss else None
        o_ref = next(it)
        acc_ref = None if single_k else next(it)

        # ---- prologue (f32 stats, bf16 MXU operand) ----
        if has_add or has_ln:
            xf = x_ref[...].astype(jnp.float32)
            if has_add:
                xf = xf + add_ref[...].astype(jnp.float32)
            if has_ln:
                mu = jnp.mean(xf, axis=-1, keepdims=True)
                xc = xf - mu
                var = jnp.mean(xc * xc, axis=-1, keepdims=True)
                xf = xc * jax.lax.rsqrt(var + 1e-5) * ln_g_ref[...] + ln_b_ref[...]
            xb = xf.astype(jnp.bfloat16)
        else:
            xb = x_ref[...].astype(jnp.bfloat16)

        part = jnp.dot(xb, w_ref[...].astype(jnp.bfloat16),
                       preferred_element_type=jnp.float32)

        def epilogue(y):
            if has_bias:
                y = y + b_ref[...]
            if activation == "gelu_new":
                y = _gelu_new(y)
            if has_res:
                y = y + res_ref[...].astype(jnp.float32)
            if has_ss:
                y = y * scale_ref[...] + shift_ref[...]
            return y.astype(o_ref.dtype)

        if single_k:
            o_ref[...] = epilogue(part)
        else:
            k = pl.program_id(2)

            @pl.when(k == 0)
            def _init():
                acc_ref[...] = jnp.zeros_like(acc_ref)

            acc_ref[...] += part

            @pl.when(k == pl.num_programs(2) - 1)
            def _flush():
                o_ref[...] = epilogue(acc_ref[...])

    return kernel


def linear_fused(x, w, b=None, *, activation=None, residual=None,
                 ln_g=None, ln_b=None, add_input=None,
                 row_scale=None, row_shift=None, out_dtype=jnp.bfloat16,
                 tile_n=256, tile_d=512, tile_k=1024):
    assert (row_scale is None) == (row_shift is None)
    assert (ln_g is None) == (ln_b is None)
    orig_shape = x.shape
    K, D = w.shape
    x2 = x.reshape(-1, K)
    N = x2.shape[0]

    has_add = add_input is not None
    has_ln = ln_g is not None
    has_bias = b is not None
    has_res = residual is not None
    has_ss = row_scale is not None

    tN = _pick_tile(N, tile_n, 16)          # bf16 sublane packing
    tD = _pick_tile(D, tile_d, 128)
    tK = K if has_ln else _pick_tile(K, tile_k, 128)   # LN prologue needs full K
    gN, gD, gK = N // tN, D // tD, K // tK
    single_k = gK == 1

    if single_k:
        grid = (gN, gD)
        xi = lambda i, j: (i, 0)
        wi = lambda i, j: (0, j)
        oi = lambda i, j: (i, j)
        rowi = lambda i, j: (i, 0)
        coli = lambda i, j: (0, j)
        zeroi = lambda i, j: (0, 0)
        dims = ("parallel", "parallel")
        scratch = []
    else:
        grid = (gN, gD, gK)
        xi = lambda i, j, k: (i, k)
        wi = lambda i, j, k: (k, j)
        oi = lambda i, j, k: (i, j)
        rowi = lambda i, j, k: (i, 0)
        coli = lambda i, j, k: (0, j)
        zeroi = lambda i, j, k: (0, 0)
        dims = ("parallel", "parallel", "arbitrary")
        scratch = [pltpu.VMEM((tN, tD), jnp.float32)]

    inputs = [x2]
    in_specs = [pl.BlockSpec((tN, tK), xi)]
    if has_add:
        inputs.append(add_input.reshape(N, K))
        in_specs.append(pl.BlockSpec((tN, tK), xi))
    inputs.append(w)
    in_specs.append(pl.BlockSpec((tK, tD), wi))
    if has_ln:
        inputs.append(ln_g.reshape(1, K).astype(jnp.float32))
        inputs.append(ln_b.reshape(1, K).astype(jnp.float32))
        in_specs.append(pl.BlockSpec((1, tK), zeroi))
        in_specs.append(pl.BlockSpec((1, tK), zeroi))
    if has_bias:
        inputs.append(b.reshape(1, D).astype(jnp.float32))
        in_specs.append(pl.BlockSpec((1, tD), coli))
    if has_res:
        inputs.append(residual.reshape(N, D))
        in_specs.append(pl.BlockSpec((tN, tD), oi))
    if has_ss:
        inputs.append(row_scale.reshape(N, 1).astype(jnp.float32))
        inputs.append(row_shift.reshape(N, 1).astype(jnp.float32))
        in_specs.append(pl.BlockSpec((tN, 1), rowi))
        in_specs.append(pl.BlockSpec((tN, 1), rowi))

    kernel = _make_linear_kernel(has_add, has_ln, has_bias, activation,
                                 has_res, has_ss, single_k)
    out = pl.pallas_call(
        kernel,
        out_shape=jax.ShapeDtypeStruct((N, D), out_dtype),
        grid=grid,
        in_specs=in_specs,
        out_specs=pl.BlockSpec((tN, tD), oi),
        scratch_shapes=scratch,
        compiler_params=pltpu.CompilerParams(dimension_semantics=dims),
    )(*inputs)
    return out.reshape(orig_shape[:-1] + (D,))


# ----------------------------------------------------------------------------
# Kernel 3: standalone LayerNorm (used only for GPT-2's final ln_f, whose
# output is itself a returned hidden state).  Row-tiled, parallel grid,
# bf16 output, f32 statistics.
# ----------------------------------------------------------------------------
def _ln_kernel(x_ref, g_ref, b_ref, o_ref):
    x = x_ref[...].astype(jnp.float32)
    mu = jnp.mean(x, axis=-1, keepdims=True)
    xc = x - mu
    var = jnp.mean(xc * xc, axis=-1, keepdims=True)
    o_ref[...] = (xc * jax.lax.rsqrt(var + 1e-5) * g_ref[...] + b_ref[...]
                  ).astype(o_ref.dtype)


def layer_norm(x, g, b):
    shp = x.shape
    D = shp[-1]
    x2 = x.reshape(-1, D)
    N = x2.shape[0]
    # keep >=2 grid steps where possible so v7x's two TensorCores both work
    target = 256 if N >= 512 else max(8, N // 2)
    tN = _pick_tile(N, target, 8)
    out = pl.pallas_call(
        _ln_kernel,
        out_shape=jax.ShapeDtypeStruct((N, D), jnp.bfloat16),
        grid=(N // tN,),
        in_specs=[
            pl.BlockSpec((tN, D), lambda i: (i, 0)),
            pl.BlockSpec((1, D), lambda i: (0, 0)),
            pl.BlockSpec((1, D), lambda i: (0, 0)),
        ],
        out_specs=pl.BlockSpec((tN, D), lambda i: (i, 0)),
        compiler_params=pltpu.CompilerParams(dimension_semantics=("parallel",)),
    )(x2, g.reshape(1, D).astype(jnp.float32), b.reshape(1, D).astype(jnp.float32))
    return out.reshape(shp)


# ----------------------------------------------------------------------------
# Kernel 4: causal multi-head self-attention directly on the fused qkv tensor.
# One batch per grid step; q/k/v sliced in-kernel from the bf16 (S, 3D) block,
# trans_b dot_general for QK^T (no explicit transpose), f32 softmax with
# approx reciprocal, per-head results stored straight into o_ref (no concat).
# ----------------------------------------------------------------------------
def _attn_kernel(qkv_ref, o_ref, *, n_heads, scale):
    S, D3 = qkv_ref.shape
    D = D3 // 3
    Dh = D // n_heads
    qkv = qkv_ref[...]                                           # (S, 3D) bf16
    row = jax.lax.broadcasted_iota(jnp.int32, (S, S), 0)
    col = jax.lax.broadcasted_iota(jnp.int32, (S, S), 1)
    causal_bias = jnp.where(col <= row, 0.0, -1e30).astype(jnp.float32)
    # TODO(synk): for long channel axes (S >~ 1024) on v7x, add flash-style
    # query tiling / fori_loop over heads to cap live (S,S) score state.
    for h in range(n_heads):
        q = qkv[:, h * Dh:(h + 1) * Dh]
        k = qkv[:, D + h * Dh:D + (h + 1) * Dh]
        v = qkv[:, 2 * D + h * Dh:2 * D + (h + 1) * Dh]
        s = jax.lax.dot_general(q, k, (((1,), (1,)), ((), ())),
                                preferred_element_type=jnp.float32)   # (S, S)
        s = s * scale + causal_bias
        m = jnp.max(s, axis=-1, keepdims=True)
        p = jnp.exp(s - m)
        denom = jnp.sum(p, axis=-1, keepdims=True)
        p = p * pl.reciprocal(denom, approx=True)
        o_ref[:, h * Dh:(h + 1) * Dh] = jnp.dot(
            p.astype(jnp.bfloat16), v, preferred_element_type=jnp.float32
        ).astype(o_ref.dtype)


def causal_attention(qkv, n_heads):
    B, S, D3 = qkv.shape
    D = D3 // 3
    scale = 1.0 / ((D // n_heads) ** 0.5)
    kernel = functools.partial(_attn_kernel, n_heads=n_heads, scale=scale)
    return pl.pallas_call(
        kernel,
        out_shape=jax.ShapeDtypeStruct((B, S, D), jnp.bfloat16),
        grid=(B,),
        in_specs=[pl.BlockSpec((None, S, D3), lambda b: (b, 0, 0))],
        out_specs=pl.BlockSpec((None, S, D), lambda b: (b, 0, 0)),
        compiler_params=pltpu.CompilerParams(dimension_semantics=("parallel",)),
    )(qkv)


# ----------------------------------------------------------------------------
# Kernel 5: batched bias-free time_proj — all (gpt_layers+1) hidden states in
# ONE pallas_call, stacked in bf16, grid over (layer, row tile).
# ----------------------------------------------------------------------------
def _time_proj_kernel(x_ref, w_ref, o_ref):
    o_ref[...] = jnp.dot(x_ref[...], w_ref[...],
                         preferred_element_type=jnp.float32).astype(o_ref.dtype)


def time_proj_all(feats, w_stacked):
    n = len(feats)
    B, S, D = feats[0].shape
    N = B * S
    xs = jnp.stack([f.reshape(N, D) for f in feats], axis=0)     # (n, N, D) bf16
    tN = _pick_tile(N, 256, 16)
    out = pl.pallas_call(
        _time_proj_kernel,
        out_shape=jax.ShapeDtypeStruct((n, N, D), jnp.float32),
        grid=(n, N // tN),
        in_specs=[
            pl.BlockSpec((None, tN, D), lambda l, i: (l, i, 0)),
            pl.BlockSpec((None, D, D), lambda l, i: (l, 0, 0)),
        ],
        out_specs=pl.BlockSpec((None, tN, D), lambda l, i: (l, i, 0)),
        compiler_params=pltpu.CompilerParams(
            dimension_semantics=("parallel", "parallel")),
    )(xs, w_stacked)
    return tuple(out[i].reshape(B, S, D) for i in range(n))


# ----------------------------------------------------------------------------
# GPT-2 trunk (LayerNorm fused into the consuming projection's prologue;
# residual / bias / GELU fused into the matmul epilogues)
# ----------------------------------------------------------------------------
def gpt2_block(x, p, n_heads):
    # TODO(synk): LoRA adapters on c_attn omitted — lora_B is zero-initialized,
    # so they contribute nothing to the forward pass.
    qkv = linear_fused(x, p["c_attn_w"], p["c_attn_b"],
                       ln_g=p["ln1_g"], ln_b=p["ln1_b"])           # (B, S, 3D) bf16
    attn = causal_attention(qkv, n_heads)                           # (B, S, D) bf16
    x = linear_fused(attn, p["c_proj_w"], p["c_proj_b"], residual=x)
    h = linear_fused(x, p["c_fc_w"], p["c_fc_b"],
                     ln_g=p["ln2_g"], ln_b=p["ln2_b"], activation="gelu_new")
    x = linear_fused(h, p["mlp_proj_w"], p["mlp_proj_b"], residual=x)
    return x


def gpt2_forward(inputs_embeds, gp, n_heads):
    B, S, D = inputs_embeds.shape
    # TODO(synk): train-mode dropout is stochastic; omitted for a deterministic kernel.
    h = (inputs_embeds.astype(jnp.float32) + gp["wpe"][:S][None, :, :]
         ).astype(jnp.bfloat16)
    hidden_states = []
    for blk in gp["blocks"]:
        hidden_states.append(h)
        h = gpt2_block(h, blk, n_heads)
    h = layer_norm(h, gp["lnf_g"], gp["lnf_b"])
    hidden_states.append(h)        # gpt_layers+1 hidden states (matches time_proj)
    return tuple(hidden_states), h


# ----------------------------------------------------------------------------
# Model.forecast / Model.forward (long_term_forecast path)
# ----------------------------------------------------------------------------
def model_forward(x, params, n_heads):
    B, L, M = x.shape
    # RevIN stats + normalize + 'b l m -> b m l' + first Linear, all fused.
    out1, means, stdev = revin_linear(x, params["linear_w"], params["linear_b"])
    feats, last = gpt2_forward(out1, params["gpt2"], n_heads)
    feats_proj = time_proj_all(feats, params["time_proj_w"])

    # Final projection (d_model -> pred_len): the `outputs_time += outputs_time1`
    # residual is fused as a prologue add and the RevIN de-normalization as a
    # per-row (batch, series) scale/shift epilogue.
    row_scale = stdev[:, 0, :].reshape(B * M, 1)
    row_shift = means[:, 0, :].reshape(B * M, 1)
    out = linear_fused(last[:, -M:, :], params["out_w"], params["out_b"],
                       add_input=out1[:, -M:, :],
                       row_scale=row_scale, row_shift=row_shift,
                       out_dtype=jnp.float32)                     # (B, M, pred_len)
    out = jnp.transpose(out, (0, 2, 1))                           # 'b m l -> b l m'
    return {"outputs_time": out, "intermidiate_time": feats_proj}


# ----------------------------------------------------------------------------
# Deterministic synthetic parameter init (shapes implied by Model.__init__).
# Matmul weights stored in bfloat16 (MXU operands); biases/LN params in f32.
# ----------------------------------------------------------------------------
def init_params(key, L, M, d_model, pred_len, gpt_layers):
    keys = iter(jax.random.split(key, 64))

    def nrm(shape, scale=0.02, dtype=jnp.bfloat16):
        return (scale * jax.random.normal(next(keys), shape)).astype(dtype)

    blocks = []
    for _ in range(gpt_layers):
        blocks.append(dict(
            ln1_g=jnp.ones((d_model,), jnp.float32),
            ln1_b=jnp.zeros((d_model,), jnp.float32),
            c_attn_w=nrm((d_model, 3 * d_model)),
            c_attn_b=jnp.zeros((3 * d_model,), jnp.float32),
            c_proj_w=nrm((d_model, d_model)),
            c_proj_b=jnp.zeros((d_model,), jnp.float32),
            ln2_g=jnp.ones((d_model,), jnp.float32),
            ln2_b=jnp.zeros((d_model,), jnp.float32),
            c_fc_w=nrm((d_model, 4 * d_model)),
            c_fc_b=jnp.zeros((4 * d_model,), jnp.float32),
            mlp_proj_w=nrm((4 * d_model, d_model)),
            mlp_proj_b=jnp.zeros((d_model,), jnp.float32),
        ))
    gpt2 = dict(
        wpe=nrm((M, d_model), dtype=jnp.float32),
        blocks=blocks,
        lnf_g=jnp.ones((d_model,), jnp.float32),
        lnf_b=jnp.zeros((d_model,), jnp.float32),
    )
    # TODO(synk): pretrained GPT-2 weights not loadable here; synthetic init.
    return dict(
        linear_w=nrm((L, d_model)),                            # nn.Linear(seq_len, d_model)
        linear_b=jnp.zeros((d_model,), jnp.float32),
        gpt2=gpt2,
        time_proj_w=nrm((gpt_layers + 1, d_model, d_model)),   # bias=False, stacked
        out_w=nrm((d_model, pred_len)),                        # nn.Linear(d_model, pred_len)
        out_b=jnp.zeros((pred_len,), jnp.float32),
    )


if __name__ == "__main__":
    # small shapes consistent with the forecast path
    B, L, M = 2, 16, 4           # batch, seq_len, enc_in (channels)
    d_model, pred_len = 32, 8
    gpt_layers, n_heads = 2, 4

    key = jax.random.PRNGKey(0)
    kx, kp = jax.random.split(key)
    x = jax.random.normal(kx, (B, L, M), dtype=jnp.float32)
    params = init_params(kp, L, M, d_model, pred_len, gpt_layers)

    fwd = jax.jit(model_forward, static_argnums=2)
    out = fwd(x, params, n_heads)
    jax.block_until_ready(out["outputs_time"])
    for f in out["intermidiate_time"]:
        jax.block_until_ready(f)

    assert out["outputs_time"].shape == (B, pred_len, M)
    assert len(out["intermidiate_time"]) == gpt_layers + 1
    assert all(f.shape == (B, M, d_model) for f in out["intermidiate_time"])
    print("KERNEL_OK")
</pallas_src>

<mosaic_0001>
module attributes {stable_mosaic.version = 11 : i64} {
  func.func @kernel(%arg0: i32, %arg1: i32, %arg2: memref<8x32xbf16, #tpu.memory_space<vmem>>, %arg3: memref<32x96xbf16, #tpu.memory_space<vmem>>, %arg4: memref<1x32xf32, #tpu.memory_space<vmem>>, %arg5: memref<1x32xf32, #tpu.memory_space<vmem>>, %arg6: memref<1x96xf32, #tpu.memory_space<vmem>>, %arg7: memref<8x96xbf16, #tpu.memory_space<vmem>>) attributes {dimension_semantics = [#tpu.dimension_semantics<parallel>, #tpu.dimension_semantics<parallel>], iteration_bounds = array<i64: 1, 1>, scalar_prefetch = 0 : i64, scratch_operands = 0 : i64, tpu.core_type = #tpu.core_type<tc>, window_params = [{transform_indices = @transform_0, window_bounds = array<i64: 8, 32>}, {transform_indices = @transform_1, window_bounds = array<i64: 32, 96>}, {pipeline_mode = #tpu.pipeline_mode<synchronous>, transform_indices = @transform_2, window_bounds = array<i64: 1, 32>}, {pipeline_mode = #tpu.pipeline_mode<synchronous>, transform_indices = @transform_3, window_bounds = array<i64: 1, 32>}, {transform_indices = @transform_4, window_bounds = array<i64: 1, 96>}, {transform_indices = @transform_5, window_bounds = array<i64: 8, 96>}]} {
    %c0 = arith.constant 0 : index
    %c0_0 = arith.constant 0 : index
    %0 = vector.load %arg2[%c0, %c0_0] : memref<8x32xbf16, #tpu.memory_space<vmem>>, vector<8x32xbf16>
    %1 = arith.extf %0 : vector<8x32xbf16> to vector<8x32xf32>
    %cst = arith.constant dense<0.000000e+00> : vector<8xf32>
    %2 = vector.multi_reduction <add>, %1, %cst [1] : vector<8x32xf32> to vector<8xf32>
    %3 = vector.shape_cast %2 : vector<8xf32> to vector<8x1xf32>
    %cst_1 = arith.constant 3.200000e+01 : f32
    %4 = vector.broadcast %cst_1 : f32 to vector<8x1xf32>
    %5 = arith.divf %3, %4 : vector<8x1xf32>
    %6 = vector.broadcast %5 : vector<8x1xf32> to vector<8x32xf32>
    %7 = arith.subf %1, %6 : vector<8x32xf32>
    %8 = arith.mulf %7, %7 : vector<8x32xf32>
    %cst_2 = arith.constant dense<0.000000e+00> : vector<8xf32>
    %9 = vector.multi_reduction <add>, %8, %cst_2 [1] : vector<8x32xf32> to vector<8xf32>
    %10 = vector.shape_cast %9 : vector<8xf32> to vector<8x1xf32>
    %cst_3 = arith.constant 3.200000e+01 : f32
    %11 = vector.broadcast %cst_3 : f32 to vector<8x1xf32>
    %12 = arith.divf %10, %11 : vector<8x1xf32>
    %cst_4 = arith.constant 9.99999974E-6 : f32
    %13 = vector.broadcast %cst_4 : f32 to vector<8x1xf32>
    %14 = arith.addf %12, %13 : vector<8x1xf32>
    %15 = math.rsqrt %14 : vector<8x1xf32>
    %16 = vector.broadcast %15 : vector<8x1xf32> to vector<8x32xf32>
    %17 = arith.mulf %7, %16 : vector<8x32xf32>
    %c0_5 = arith.constant 0 : index
    %c0_6 = arith.constant 0 : index
    %18 = vector.load %arg4[%c0_5, %c0_6] : memref<1x32xf32, #tpu.memory_space<vmem>>, vector<1x32xf32>
    %19 = vector.broadcast %18 : vector<1x32xf32> to vector<8x32xf32>
    %20 = arith.mulf %17, %19 : vector<8x32xf32>
    %c0_7 = arith.constant 0 : index
    %c0_8 = arith.constant 0 : index
    %21 = vector.load %arg5[%c0_7, %c0_8] : memref<1x32xf32, #tpu.memory_space<vmem>>, vector<1x32xf32>
    %22 = vector.broadcast %21 : vector<1x32xf32> to vector<8x32xf32>
    %23 = arith.addf %20, %22 : vector<8x32xf32>
    %24 = arith.truncf %23 : vector<8x32xf32> to vector<8x32xbf16>
    %c0_9 = arith.constant 0 : index
    %c0_10 = arith.constant 0 : index
    %25 = vector.load %arg3[%c0_9, %c0_10] : memref<32x96xbf16, #tpu.memory_space<vmem>>, vector<32x96xbf16>
    %cst_11 = arith.constant dense<0.000000e+00> : vector<8x96xf32>
    %26 = tpu.matmul %24, %25, %cst_11 {dimension_numbers = #tpu.dot_dimension_numbers<[1], [0], [0], [1], [0, 0, 1, 1], [], []>} : vector<8x32xbf16>, vector<32x96xbf16>, vector<8x96xf32> -> vector<8x96xf32>
    %c0_12 = arith.constant 0 : index
    %c0_13 = arith.constant 0 : index
    %27 = vector.load %arg6[%c0_12, %c0_13] : memref<1x96xf32, #tpu.memory_space<vmem>>, vector<1x96xf32>
    %28 = vector.broadcast %27 : vector<1x96xf32> to vector<8x96xf32>
    %29 = arith.addf %26, %28 : vector<8x96xf32>
    %30 = arith.truncf %29 : vector<8x96xf32> to vector<8x96xbf16>
    %c0_14 = arith.constant 0 : index
    %c0_15 = arith.constant 0 : index
    %31 = vector.load %arg7[%c0_14, %c0_15] : memref<8x96xbf16, #tpu.memory_space<vmem>>, vector<8x96xbf16>
    tpu.vector_store %arg7[%c0_14, %c0_15], %30 {strides = array<i32>} : memref<8x96xbf16, #tpu.memory_space<vmem>>, vector<8x96xbf16>,
    return
  }
  func.func @transform_0(%arg0: i32, %arg1: i32) -> (i32, i32) {
    %c0_i32 = arith.constant 0 : i32
    %c0_i32_0 = arith.constant 0 : i32
    return %arg0, %c0_i32 : i32, i32
  }
  func.func @transform_1(%arg0: i32, %arg1: i32) -> (i32, i32) {
    %c0_i32 = arith.constant 0 : i32
    %c0_i32_0 = arith.constant 0 : i32
    return %c0_i32, %arg1 : i32, i32
  }
  func.func @transform_2(%arg0: i32, %arg1: i32) -> (i32, i32) {
    %c0_i32 = arith.constant 0 : i32
    %c0_i32_0 = arith.constant 0 : i32
    %c0_i32_1 = arith.constant 0 : i32
    return %c0_i32, %c0_i32_0 : i32, i32
  }
  func.func @transform_3(%arg0: i32, %arg1: i32) -> (i32, i32) {
    %c0_i32 = arith.constant 0 : i32
    %c0_i32_0 = arith.constant 0 : i32
    %c0_i32_1 = arith.constant 0 : i32
    return %c0_i32, %c0_i32_0 : i32, i32
  }
  func.func @transform_4(%arg0: i32, %arg1: i32) -> (i32, i32) {
    %c0_i32 = arith.constant 0 : i32
    %c0_i32_0 = arith.constant 0 : i32
    return %c0_i32, %arg1 : i32, i32
  }
  func.func @transform_5(%arg0: i32, %arg1: i32) -> (i32, i32) {
    %c0_i32 = arith.constant 0 : i32
    return %arg0, %arg1 : i32, i32
  }
}

module attributes {stable_mosaic.version = 11 : i64} {
  func.func @_revin_linear_kernel(%arg0: i32, %arg1: memref<1x16x4xf32, #tpu.memory_space<vmem>>, %arg2: memref<16x32xbf16, #tpu.memory_space<vmem>>, %arg3: memref<1x32xf32, #tpu.memory_space<vmem>>, %arg4: memref<1x4x32xbf16, #tpu.memory_space<vmem>>, %arg5: memref<1x1x4xf32, #tpu.memory_space<vmem>>, %arg6: memref<1x1x4xf32, #tpu.memory_space<vmem>>) attributes {dimension_semantics = [#tpu.dimension_semantics<parallel>], iteration_bounds = array<i64: 2>, scalar_prefetch = 0 : i64, scratch_operands = 0 : i64, tpu.core_type = #tpu.core_type<tc>, window_params = [{transform_indices = @transform_0, window_bounds = array<i64: 1, 16, 4>}, {pipeline_mode = #tpu.pipeline_mode<synchronous>, transform_indices = @transform_1, window_bounds = array<i64: 16, 32>}, {pipeline_mode = #tpu.pipeline_mode<synchronous>, transform_indices = @transform_2, window_bounds = array<i64: 1, 32>}, {transform_indices = @transform_3, window_bounds = array<i64: 1, 4, 32>}, {transform_indices = @transform_4, window_bounds = array<i64: 1, 1, 4>}, {transform_indices = @transform_5, window_bounds = array<i64: 1, 1, 4>}]} {
    %c0 = arith.constant 0 : index
    %c0_0 = arith.constant 0 : index
    %c0_1 = arith.constant 0 : index
    %0 = vector.load %arg1[%c0, %c0_0, %c0_1] : memref<1x16x4xf32, #tpu.memory_space<vmem>>, vector<1x16x4xf32>
    %1 = vector.shape_cast %0 : vector<1x16x4xf32> to vector<16x4xf32>
    %cst = arith.constant dense<0.000000e+00> : vector<4xf32>
    %2 = vector.multi_reduction <add>, %1, %cst [0] : vector<16x4xf32> to vector<4xf32>
    %3 = vector.shape_cast %2 : vector<4xf32> to vector<1x4xf32>
    %cst_2 = arith.constant 1.600000e+01 : f32
    %4 = vector.broadcast %cst_2 : f32 to vector<1x4xf32>
    %5 = arith.divf %3, %4 : vector<1x4xf32>
    %6 = vector.broadcast %5 : vector<1x4xf32> to vector<16x4xf32>
    %7 = arith.subf %1, %6 : vector<16x4xf32>
    %8 = arith.mulf %7, %7 : vector<16x4xf32>
    %cst_3 = arith.constant dense<0.000000e+00> : vector<4xf32>
    %9 = vector.multi_reduction <add>, %8, %cst_3 [0] : vector<16x4xf32> to vector<4xf32>
    %10 = vector.shape_cast %9 : vector<4xf32> to vector<1x4xf32>
    %cst_4 = arith.constant 1.600000e+01 : f32
    %11 = vector.broadcast %cst_4 : f32 to vector<1x4xf32>
    %12 = arith.divf %10, %11 : vector<1x4xf32>
    %cst_5 = arith.constant 9.99999974E-6 : f32
    %13 = vector.broadcast %cst_5 : f32 to vector<1x4xf32>
    %14 = arith.addf %12, %13 : vector<1x4xf32>
    %15 = math.rsqrt %14 : vector<1x4xf32>
    %16 = vector.broadcast %15 : vector<1x4xf32> to vector<16x4xf32>
    %17 = arith.mulf %7, %16 : vector<16x4xf32>
    %18 = arith.truncf %17 : vector<16x4xf32> to vector<16x4xbf16>
    %c0_6 = arith.constant 0 : index
    %c0_7 = arith.constant 0 : index
    %19 = vector.load %arg2[%c0_6, %c0_7] : memref<16x32xbf16, #tpu.memory_space<vmem>>, vector<16x32xbf16>
    %cst_8 = arith.constant dense<0.000000e+00> : vector<4x32xf32>
    %20 = tpu.matmul %18, %19, %cst_8 {dimension_numbers = #tpu.dot_dimension_numbers<[0], [0], [1], [1], [0, 1, 1, 1], [], []>} : vector<16x4xbf16>, vector<16x32xbf16>, vector<4x32xf32> -> vector<4x32xf32>
    %c0_9 = arith.constant 0 : index
    %c0_10 = arith.constant 0 : index
    %21 = vector.load %arg3[%c0_9, %c0_10] : memref<1x32xf32, #tpu.memory_space<vmem>>, vector<1x32xf32>
    %22 = vector.broadcast %21 : vector<1x32xf32> to vector<4x32xf32>
    %23 = arith.addf %20, %22 : vector<4x32xf32>
    %24 = arith.truncf %23 : vector<4x32xf32> to vector<4x32xbf16>
    %c0_11 = arith.constant 0 : index
    %c0_12 = arith.constant 0 : index
    %c0_13 = arith.constant 0 : index
    %25 = vector.load %arg4[%c0_11, %c0_12, %c0_13] : memref<1x4x32xbf16, #tpu.memory_space<vmem>>, vector<1x4x32xbf16>
    %26 = vector.shape_cast %25 : vector<1x4x32xbf16> to vector<4x32xbf16>
    %27 = vector.shape_cast %24 : vector<4x32xbf16> to vector<1x4x32xbf16>
    tpu.vector_store %arg4[%c0_11, %c0_12, %c0_13], %27 {strides = array<i32>} : memref<1x4x32xbf16, #tpu.memory_space<vmem>>, vector<1x4x32xbf16>,
    %c0_14 = arith.constant 0 : index
    %c0_15 = arith.constant 0 : index
    %c0_16 = arith.constant 0 : index
    %28 = vector.load %arg5[%c0_14, %c0_15, %c0_16] : memref<1x1x4xf32, #tpu.memory_space<vmem>>, vector<1x1x4xf32>
    %29 = vector.shape_cast %28 : vector<1x1x4xf32> to vector<1x4xf32>
    %30 = vector.shape_cast %5 : vector<1x4xf32> to vector<1x1x4xf32>
    tpu.vector_store %arg5[%c0_14, %c0_15, %c0_16], %30 {strides = array<i32>} : memref<1x1x4xf32, #tpu.memory_space<vmem>>, vector<1x1x4xf32>,
    %cst_17 = arith.constant 9.99999974E-6 : f32
    %31 = vector.broadcast %cst_17 : f32 to vector<1x4xf32>
    %32 = arith.addf %12, %31 : vector<1x4xf32>
    %33 = math.sqrt %32 : vector<1x4xf32>
    %c0_18 = arith.constant 0 : index
    %c0_19 = arith.constant 0 : index
    %c0_20 = arith.constant 0 : index
    %34 = vector.load %arg6[%c0_18, %c0_19, %c0_20] : memref<1x1x4xf32, #tpu.memory_space<vmem>>, vector<1x1x4xf32>
    %35 = vector.shape_cast %34 : vector<1x1x4xf32> to vector<1x4xf32>
    %36 = vector.shape_cast %33 : vector<1x4xf32> to vector<1x1x4xf32>
    tpu.vector_store %arg6[%c0_18, %c0_19, %c0_20], %36 {strides = array<i32>} : memref<1x1x4xf32, #tpu.memory_space<vmem>>, vector<1x1x4xf32>,
    return
  }
  func.func @transform_0(%arg0: i32) -> (i32, i32, i32) {
    %c0_i32 = arith.constant 0 : i32
    %c0_i32_0 = arith.constant 0 : i32
    %c0_i32_1 = arith.constant 0 : i32
    return %arg0, %c0_i32, %c0_i32_0 : i32, i32, i32
  }
  func.func @transform_1(%arg0: i32) -> (i32, i32) {
    %c0_i32 = arith.constant 0 : i32
    %c0_i32_0 = arith.constant 0 : i32
    %c0_i32_1 = arith.constant 0 : i32
    return %c0_i32, %c0_i32_0 : i32, i32
  }
  func.func @transform_2(%arg0: i32) -> (i32, i32) {
    %c0_i32 = arith.constant 0 : i32
    %c0_i32_0 = arith.constant 0 : i32
    %c0_i32_1 = arith.constant 0 : i32
    return %c0_i32, %c0_i32_0 : i32, i32
  }
  func.func @transform_3(%arg0: i32) -> (i32, i32, i32) {
    %c0_i32 = arith.constant 0 : i32
    %c0_i32_0 = arith.constant 0 : i32
    %c0_i32_1 = arith.constant 0 : i32
    return %arg0, %c0_i32, %c0_i32_0 : i32, i32, i32
  }
  func.func @transform_4(%arg0: i32) -> (i32, i32, i32) {
    %c0_i32 = arith.constant 0 : i32
    %c0_i32_0 = arith.constant 0 : i32
    %c0_i32_1 = arith.constant 0 : i32
    return %arg0, %c0_i32, %c0_i32_0 : i32, i32, i32
  }
  func.func @transform_5(%arg0: i32) -> (i32, i32, i32) {
    %c0_i32 = arith.constant 0 : i32
    %c0_i32_0 = arith.constant 0 : i32
    %c0_i32_1 = arith.constant 0 : i32
    return %arg0, %c0_i32, %c0_i32_0 : i32, i32, i32
  }
}

module attributes {stable_mosaic.version = 11 : i64} {
  func.func @kernel(%arg0: i32, %arg1: i32, %arg2: memref<8x32xbf16, #tpu.memory_space<vmem>>, %arg3: memref<32x32xbf16, #tpu.memory_space<vmem>>, %arg4: memref<1x32xf32, #tpu.memory_space<vmem>>, %arg5: memref<8x32xbf16, #tpu.memory_space<vmem>>, %arg6: memref<8x32xbf16, #tpu.memory_space<vmem>>) attributes {dimension_semantics = [#tpu.dimension_semantics<parallel>, #tpu.dimension_semantics<parallel>], iteration_bounds = array<i64: 1, 1>, scalar_prefetch = 0 : i64, scratch_operands = 0 : i64, tpu.core_type = #tpu.core_type<tc>, window_params = [{transform_indices = @transform_0, window_bounds = array<i64: 8, 32>}, {transform_indices = @transform_1, window_bounds = array<i64: 32, 32>}, {transform_indices = @transform_2, window_bounds = array<i64: 1, 32>}, {transform_indices = @transform_3, window_bounds = array<i64: 8, 32>}, {transform_indices = @transform_4, window_bounds = array<i64: 8, 32>}]} {
    %c0 = arith.constant 0 : index
    %c0_0 = arith.constant 0 : index
    %0 = vector.load %arg2[%c0, %c0_0] : memref<8x32xbf16, #tpu.memory_space<vmem>>, vector<8x32xbf16>
    %c0_1 = arith.constant 0 : index
    %c0_2 = arith.constant 0 : index
    %1 = vector.load %arg3[%c0_1, %c0_2] : memref<32x32xbf16, #tpu.memory_space<vmem>>, vector<32x32xbf16>
    %cst = arith.constant dense<0.000000e+00> : vector<8x32xf32>
    %2 = tpu.matmul %0, %1, %cst {dimension_numbers = #tpu.dot_dimension_numbers<[1], [0], [0], [1], [0, 0, 1, 1], [], []>} : vector<8x32xbf16>, vector<32x32xbf16>, vector<8x32xf32> -> vector<8x32xf32>
    %c0_3 = arith.constant 0 : index
    %c0_4 = arith.constant 0 : index
    %3 = vector.load %arg4[%c0_3, %c0_4] : memref<1x32xf32, #tpu.memory_space<vmem>>, vector<1x32xf32>
    %4 = vector.broadcast %3 : vector<1x32xf32> to vector<8x32xf32>
    %5 = arith.addf %2, %4 : vector<8x32xf32>
    %c0_5 = arith.constant 0 : index
    %c0_6 = arith.constant 0 : index
    %6 = vector.load %arg5[%c0_5, %c0_6] : memref<8x32xbf16, #tpu.memory_space<vmem>>, vector<8x32xbf16>
    %7 = arith.extf %6 : vector<8x32xbf16> to vector<8x32xf32>
    %8 = arith.addf %5, %7 : vector<8x32xf32>
    %9 = arith.truncf %8 : vector<8x32xf32> to vector<8x32xbf16>
    %c0_7 = arith.constant 0 : index
    %c0_8 = arith.constant 0 : index
    %10 = vector.load %arg6[%c0_7, %c0_8] : memref<8x32xbf16, #tpu.memory_space<vmem>>, vector<8x32xbf16>
    tpu.vector_store %arg6[%c0_7, %c0_8], %9 {strides = array<i32>} : memref<8x32xbf16, #tpu.memory_space<vmem>>, vector<8x32xbf16>,
    return
  }
  func.func @transform_0(%arg0: i32, %arg1: i32) -> (i32, i32) {
    %c0_i32 = arith.constant 0 : i32
    %c0_i32_0 = arith.constant 0 : i32
    return %arg0, %c0_i32 : i32, i32
  }
  func.func @transform_1(%arg0: i32, %arg1: i32) -> (i32, i32) {
    %c0_i32 = arith.constant 0 : i32
    %c0_i32_0 = arith.constant 0 : i32
    return %c0_i32, %arg1 : i32, i32
  }
  func.func @transform_2(%arg0: i32, %arg1: i32) -> (i32, i32) {
    %c0_i32 = arith.constant 0 : i32
    %c0_i32_0 = arith.constant 0 : i32
    return %c0_i32, %arg1 : i32, i32
  }
  func.func @transform_3(%arg0: i32, %arg1: i32) -> (i32, i32) {
    %c0_i32 = arith.constant 0 : i32
    return %arg0, %arg1 : i32, i32
  }
  func.func @transform_4(%arg0: i32, %arg1: i32) -> (i32, i32) {
    %c0_i32 = arith.constant 0 : i32
    return %arg0, %arg1 : i32, i32
  }
}

module attributes {stable_mosaic.version = 11 : i64} {
  func.func @_attn_kernel(%arg0: i32, %arg1: memref<1x4x96xbf16, #tpu.memory_space<vmem>>, %arg2: memref<1x4x32xbf16, #tpu.memory_space<vmem>>) attributes {dimension_semantics = [#tpu.dimension_semantics<parallel>], iteration_bounds = array<i64: 2>, scalar_prefetch = 0 : i64, scratch_operands = 0 : i64, tpu.core_type = #tpu.core_type<tc>, window_params = [{transform_indices = @transform_0, window_bounds = array<i64: 1, 4, 96>}, {transform_indices = @transform_1, window_bounds = array<i64: 1, 4, 32>}]} {
    %c0 = arith.constant 0 : index
    %c0_0 = arith.constant 0 : index
    %c0_1 = arith.constant 0 : index
    %0 = vector.load %arg1[%c0, %c0_0, %c0_1] : memref<1x4x96xbf16, #tpu.memory_space<vmem>>, vector<1x4x96xbf16>
    %1 = vector.shape_cast %0 : vector<1x4x96xbf16> to vector<4x96xbf16>
    %2 = tpu.iota {dimensions = array<i32: 0>} : vector<4x4xi32>
    %3 = tpu.iota {dimensions = array<i32: 1>} : vector<4x4xi32>
    %4 = arith.cmpi sle, %3, %2 : vector<4x4xi32>
    %cst = arith.constant 0.000000e+00 : f32
    %cst_2 = arith.constant -1.000000e+30 : f32
    %5 = vector.broadcast %cst : f32 to vector<4x4xf32>
    %6 = vector.broadcast %cst_2 : f32 to vector<4x4xf32>
    %7 = arith.select %4, %5, %6 : vector<4x4xi1>, vector<4x4xf32>
    %8 = vector.extract_strided_slice %1 {offsets = [0, 0], sizes = [4, 8], strides = [1, 1]} : vector<4x96xbf16> to vector<4x8xbf16>
    %9 = vector.extract_strided_slice %1 {offsets = [0, 32], sizes = [4, 8], strides = [1, 1]} : vector<4x96xbf16> to vector<4x8xbf16>
    %10 = vector.extract_strided_slice %1 {offsets = [0, 64], sizes = [4, 8], strides = [1, 1]} : vector<4x96xbf16> to vector<4x8xbf16>
    %cst_3 = arith.constant dense<0.000000e+00> : vector<4x4xf32>
    %11 = tpu.matmul %8, %9, %cst_3 {dimension_numbers = #tpu.dot_dimension_numbers<[1], [1], [0], [0], [0, 0, 1, 0], [], []>} : vector<4x8xbf16>, vector<4x8xbf16>, vector<4x4xf32> -> vector<4x4xf32>
    %cst_4 = arith.constant 0.353553385 : f32
    %12 = vector.broadcast %cst_4 : f32 to vector<4x4xf32>
    %13 = arith.mulf %11, %12 : vector<4x4xf32>
    %14 = arith.addf %13, %7 : vector<4x4xf32>
    %cst_5 = arith.constant dense<0xFF800000> : vector<4xf32>
    %15 = vector.multi_reduction <maximumf>, %14, %cst_5 [1] : vector<4x4xf32> to vector<4xf32>
    %16 = vector.shape_cast %15 : vector<4xf32> to vector<4x1xf32>
    %17 = vector.broadcast %16 : vector<4x1xf32> to vector<4x4xf32>
    %18 = arith.subf %14, %17 : vector<4x4xf32>
    %19 = math.exp %18 : vector<4x4xf32>
    %cst_6 = arith.constant dense<0.000000e+00> : vector<4xf32>
    %20 = vector.multi_reduction <add>, %19, %cst_6 [1] : vector<4x4xf32> to vector<4xf32>
    %21 = vector.shape_cast %20 : vector<4xf32> to vector<4x1xf32>
    %22 = tpu.reciprocal %21 {approx = true} : vector<4x1xf32> -> vector<4x1xf32>
    %23 = vector.broadcast %22 : vector<4x1xf32> to vector<4x4xf32>
    %24 = arith.mulf %19, %23 : vector<4x4xf32>
    %25 = arith.truncf %24 : vector<4x4xf32> to vector<4x4xbf16>
    %cst_7 = arith.constant dense<0.000000e+00> : vector<4x8xf32>
    %26 = tpu.matmul %25, %10, %cst_7 {dimension_numbers = #tpu.dot_dimension_numbers<[1], [0], [0], [1], [0, 0, 1, 1], [], []>} : vector<4x4xbf16>, vector<4x8xbf16>, vector<4x8xf32> -> vector<4x8xf32>
    %27 = arith.truncf %26 : vector<4x8xf32> to vector<4x8xbf16>
    %c0_8 = arith.constant 0 : index
    %c0_9 = arith.constant 0 : index
    %c0_10 = arith.constant 0 : index
    %28 = vector.load %arg2[%c0_8, %c0_9, %c0_10] : memref<1x4x32xbf16, #tpu.memory_space<vmem>>, vector<1x4x8xbf16>
    %29 = vector.shape_cast %28 : vector<1x4x8xbf16> to vector<4x8xbf16>
    %30 = vector.shape_cast %27 : vector<4x8xbf16> to vector<1x4x8xbf16>
    tpu.vector_store %arg2[%c0_8, %c0_9, %c0_10], %30 {strides = array<i32>} : memref<1x4x32xbf16, #tpu.memory_space<vmem>>, vector<1x4x8xbf16>,
    %31 = vector.extract_strided_slice %1 {offsets = [0, 8], sizes = [4, 8], strides = [1, 1]} : vector<4x96xbf16> to vector<4x8xbf16>
    %32 = vector.extract_strided_slice %1 {offsets = [0, 40], sizes = [4, 8], strides = [1, 1]} : vector<4x96xbf16> to vector<4x8xbf16>
    %33 = vector.extract_strided_slice %1 {offsets = [0, 72], sizes = [4, 8], strides = [1, 1]} : vector<4x96xbf16> to vector<4x8xbf16>
    %cst_11 = arith.constant dense<0.000000e+00> : vector<4x4xf32>
    %34 = tpu.matmul %31, %32, %cst_11 {dimension_numbers = #tpu.dot_dimension_numbers<[1], [1], [0], [0], [0, 0, 1, 0], [], []>} : vector<4x8xbf16>, vector<4x8xbf16>, vector<4x4xf32> -> vector<4x4xf32>
    %cst_12 = arith.constant 0.353553385 : f32
    %35 = vector.broadcast %cst_12 : f32 to vector<4x4xf32>
    %36 = arith.mulf %34, %35 : vector<4x4xf32>
    %37 = arith.addf %36, %7 : vector<4x4xf32>
    %cst_13 = arith.constant dense<0xFF800000> : vector<4xf32>
    %38 = vector.multi_reduction <maximumf>, %37, %cst_13 [1] : vector<4x4xf32> to vector<4xf32>
    %39 = vector.shape_cast %38 : vector<4xf32> to vector<4x1xf32>
    %40 = vector.broadcast %39 : vector<4x1xf32> to vector<4x4xf32>
    %41 = arith.subf %37, %40 : vector<4x4xf32>
    %42 = math.exp %41 : vector<4x4xf32>
    %cst_14 = arith.constant dense<0.000000e+00> : vector<4xf32>
    %43 = vector.multi_reduction <add>, %42, %cst_14 [1] : vector<4x4xf32> to vector<4xf32>
    %44 = vector.shape_cast %43 : vector<4xf32> to vector<4x1xf32>
    %45 = tpu.reciprocal %44 {approx = true} : vector<4x1xf32> -> vector<4x1xf32>
    %46 = vector.broadcast %45 : vector<4x1xf32> to vector<4x4xf32>
    %47 = arith.mulf %42, %46 : vector<4x4xf32>
    %48 = arith.truncf %47 : vector<4x4xf32> to vector<4x4xbf16>
    %cst_15 = arith.constant dense<0.000000e+00> : vector<4x8xf32>
    %49 = tpu.matmul %48, %33, %cst_15 {dimension_numbers = #tpu.dot_dimension_numbers<[1], [0], [0], [1], [0, 0, 1, 1], [], []>} : vector<4x4xbf16>, vector<4x8xbf16>, vector<4x8xf32> -> vector<4x8xf32>
    %50 = arith.truncf %49 : vector<4x8xf32> to vector<4x8xbf16>
    %c0_16 = arith.constant 0 : index
    %c0_17 = arith.constant 0 : index
    %c8 = arith.constant 8 : index
    %51 = vector.load %arg2[%c0_16, %c0_17, %c8] : memref<1x4x32xbf16, #tpu.memory_space<vmem>>, vector<1x4x8xbf16>
    %52 = vector.shape_cast %51 : vector<1x4x8xbf16> to vector<4x8xbf16>
    %53 = vector.shape_cast %50 : vector<4x8xbf16> to vector<1x4x8xbf16>
    tpu.vector_store %arg2[%c0_16, %c0_17, %c8], %53 {strides = array<i32>} : memref<1x4x32xbf16, #tpu.memory_space<vmem>>, vector<1x4x8xbf16>,
    %54 = vector.extract_strided_slice %1 {offsets = [0, 16], sizes = [4, 8], strides = [1, 1]} : vector<4x96xbf16> to vector<4x8xbf16>
    %55 = vector.extract_strided_slice %1 {offsets = [0, 48], sizes = [4, 8], strides = [1, 1]} : vector<4x96xbf16> to vector<4x8xbf16>
    %56 = vector.extract_strided_slice %1 {offsets = [0, 80], sizes = [4, 8], strides = [1, 1]} : vector<4x96xbf16> to vector<4x8xbf16>
    %cst_18 = arith.constant dense<0.000000e+00> : vector<4x4xf32>
    %57 = tpu.matmul %54, %55, %cst_18 {dimension_numbers = #tpu.dot_dimension_numbers<[1], [1], [0], [0], [0, 0, 1, 0], [], []>} : vector<4x8xbf16>, vector<4x8xbf16>, vector<4x4xf32> -> vector<4x4xf32>
    %cst_19 = arith.constant 0.353553385 : f32
    %58 = vector.broadcast %cst_19 : f32 to vector<4x4xf32>
    %59 = arith.mulf %57, %58 : vector<4x4xf32>
    %60 = arith.addf %59, %7 : vector<4x4xf32>
    %cst_20 = arith.constant dense<0xFF800000> : vector<4xf32>
    %61 = vector.multi_reduction <maximumf>, %60, %cst_20 [1] : vector<4x4xf32> to vector<4xf32>
    %62 = vector.shape_cast %61 : vector<4xf32> to vector<4x1xf32>
    %63 = vector.broadcast %62 : vector<4x1xf32> to vector<4x4xf32>
    %64 = arith.subf %60, %63 : vector<4x4xf32>
    %65 = math.exp %64 : vector<4x4xf32>
    %cst_21 = arith.constant dense<0.000000e+00> : vector<4xf32>
    %66 = vector.multi_reduction <add>, %65, %cst_21 [1] : vector<4x4xf32> to vector<4xf32>
    %67 = vector.shape_cast %66 : vector<4xf32> to vector<4x1xf32>
    %68 = tpu.reciprocal %67 {approx = true} : vector<4x1xf32> -> vector<4x1xf32>
    %69 = vector.broadcast %68 : vector<4x1xf32> to vector<4x4xf32>
    %70 = arith.mulf %65, %69 : vector<4x4xf32>
    %71 = arith.truncf %70 : vector<4x4xf32> to vector<4x4xbf16>
    %cst_22 = arith.constant dense<0.000000e+00> : vector<4x8xf32>
    %72 = tpu.matmul %71, %56, %cst_22 {dimension_numbers = #tpu.dot_dimension_numbers<[1], [0], [0], [1], [0, 0, 1, 1], [], []>} : vector<4x4xbf16>, vector<4x8xbf16>, vector<4x8xf32> -> vector<4x8xf32>
    %73 = arith.truncf %72 : vector<4x8xf32> to vector<4x8xbf16>
    %c0_23 = arith.constant 0 : index
    %c0_24 = arith.constant 0 : index
    %c16 = arith.constant 16 : index
    %74 = vector.load %arg2[%c0_23, %c0_24, %c16] : memref<1x4x32xbf16, #tpu.memory_space<vmem>>, vector<1x4x8xbf16>
    %75 = vector.shape_cast %74 : vector<1x4x8xbf16> to vector<4x8xbf16>
    %76 = vector.shape_cast %73 : vector<4x8xbf16> to vector<1x4x8xbf16>
    tpu.vector_store %arg2[%c0_23, %c0_24, %c16], %76 {strides = array<i32>} : memref<1x4x32xbf16, #tpu.memory_space<vmem>>, vector<1x4x8xbf16>,
    %77 = vector.extract_strided_slice %1 {offsets = [0, 24], sizes = [4, 8], strides = [1, 1]} : vector<4x96xbf16> to vector<4x8xbf16>
    %78 = vector.extract_strided_slice %1 {offsets = [0, 56], sizes = [4, 8], strides = [1, 1]} : vector<4x96xbf16> to vector<4x8xbf16>
    %79 = vector.extract_strided_slice %1 {offsets = [0, 88], sizes = [4, 8], strides = [1, 1]} : vector<4x96xbf16> to vector<4x8xbf16>
    %cst_25 = arith.constant dense<0.000000e+00> : vector<4x4xf32>
    %80 = tpu.matmul %77, %78, %cst_25 {dimension_numbers = #tpu.dot_dimension_numbers<[1], [1], [0], [0], [0, 0, 1, 0], [], []>} : vector<4x8xbf16>, vector<4x8xbf16>, vector<4x4xf32> -> vector<4x4xf32>
    %cst_26 = arith.constant 0.353553385 : f32
    %81 = vector.broadcast %cst_26 : f32 to vector<4x4xf32>
    %82 = arith.mulf %80, %81 : vector<4x4xf32>
    %83 = arith.addf %82, %7 : vector<4x4xf32>
    %cst_27 = arith.constant dense<0xFF800000> : vector<4xf32>
    %84 = vector.multi_reduction <maximumf>, %83, %cst_27 [1] : vector<4x4xf32> to vector<4xf32>
    %85 = vector.shape_cast %84 : vector<4xf32> to vector<4x1xf32>
    %86 = vector.broadcast %85 : vector<4x1xf32> to vector<4x4xf32>
    %87 = arith.subf %83, %86 : vector<4x4xf32>
    %88 = math.exp %87 : vector<4x4xf32>
    %cst_28 = arith.constant dense<0.000000e+00> : vector<4xf32>
    %89 = vector.multi_reduction <add>, %88, %cst_28 [1] : vector<4x4xf32> to vector<4xf32>
    %90 = vector.shape_cast %89 : vector<4xf32> to vector<4x1xf32>
    %91 = tpu.reciprocal %90 {approx = true} : vector<4x1xf32> -> vector<4x1xf32>
    %92 = vector.broadcast %91 : vector<4x1xf32> to vector<4x4xf32>
    %93 = arith.mulf %88, %92 : vector<4x4xf32>
    %94 = arith.truncf %93 : vector<4x4xf32> to vector<4x4xbf16>
    %cst_29 = arith.constant dense<0.000000e+00> : vector<4x8xf32>
    %95 = tpu.matmul %94, %79, %cst_29 {dimension_numbers = #tpu.dot_dimension_numbers<[1], [0], [0], [1], [0, 0, 1, 1], [], []>} : vector<4x4xbf16>, vector<4x8xbf16>, vector<4x8xf32> -> vector<4x8xf32>
    %96 = arith.truncf %95 : vector<4x8xf32> to vector<4x8xbf16>
    %c0_30 = arith.constant 0 : index
    %c0_31 = arith.constant 0 : index
    %c24 = arith.constant 24 : index
    %97 = vector.load %arg2[%c0_30, %c0_31, %c24] : memref<1x4x32xbf16, #tpu.memory_space<vmem>>, vector<1x4x8xbf16>
    %98 = vector.shape_cast %97 : vector<1x4x8xbf16> to vector<4x8xbf16>
    %99 = vector.shape_cast %96 : vector<4x8xbf16> to vector<1x4x8xbf16>
    tpu.vector_store %arg2[%c0_30, %c0_31, %c24], %99 {strides = array<i32>} : memref<1x4x32xbf16, #tpu.memory_space<vmem>>, vector<1x4x8xbf16>,
    return
  }
  func.func @transform_0(%arg0: i32) -> (i32, i32, i32) {
    %c0_i32 = arith.constant 0 : i32
    %c0_i32_0 = arith.constant 0 : i32
    %c0_i32_1 = arith.constant 0 : i32
    return %arg0, %c0_i32, %c0_i32_0 : i32, i32, i32
  }
  func.func @transform_1(%arg0: i32) -> (i32, i32, i32) {
    %c0_i32 = arith.constant 0 : i32
    %c0_i32_0 = arith.constant 0 : i32
    %c0_i32_1 = arith.constant 0 : i32
    return %arg0, %c0_i32, %c0_i32_0 : i32, i32, i32
  }
}

module attributes {stable_mosaic.version = 11 : i64} {
  func.func @kernel(%arg0: i32, %arg1: i32, %arg2: memref<8x32xbf16, #tpu.memory_space<vmem>>, %arg3: memref<32x128xbf16, #tpu.memory_space<vmem>>, %arg4: memref<1x32xf32, #tpu.memory_space<vmem>>, %arg5: memref<1x32xf32, #tpu.memory_space<vmem>>, %arg6: memref<1x128xf32, #tpu.memory_space<vmem>>, %arg7: memref<8x128xbf16, #tpu.memory_space<vmem>>) attributes {dimension_semantics = [#tpu.dimension_semantics<parallel>, #tpu.dimension_semantics<parallel>], iteration_bounds = array<i64: 1, 1>, scalar_prefetch = 0 : i64, scratch_operands = 0 : i64, tpu.core_type = #tpu.core_type<tc>, window_params = [{transform_indices = @transform_0, window_bounds = array<i64: 8, 32>}, {transform_indices = @transform_1, window_bounds = array<i64: 32, 128>}, {pipeline_mode = #tpu.pipeline_mode<synchronous>, transform_indices = @transform_2, window_bounds = array<i64: 1, 32>}, {pipeline_mode = #tpu.pipeline_mode<synchronous>, transform_indices = @transform_3, window_bounds = array<i64: 1, 32>}, {transform_indices = @transform_4, window_bounds = array<i64: 1, 128>}, {transform_indices = @transform_5, window_bounds = array<i64: 8, 128>}]} {
    %c0 = arith.constant 0 : index
    %c0_0 = arith.constant 0 : index
    %0 = vector.load %arg2[%c0, %c0_0] : memref<8x32xbf16, #tpu.memory_space<vmem>>, vector<8x32xbf16>
    %1 = arith.extf %0 : vector<8x32xbf16> to vector<8x32xf32>
    %cst = arith.constant dense<0.000000e+00> : vector<8xf32>
    %2 = vector.multi_reduction <add>, %1, %cst [1] : vector<8x32xf32> to vector<8xf32>
    %3 = vector.shape_cast %2 : vector<8xf32> to vector<8x1xf32>
    %cst_1 = arith.constant 3.200000e+01 : f32
    %4 = vector.broadcast %cst_1 : f32 to vector<8x1xf32>
    %5 = arith.divf %3, %4 : vector<8x1xf32>
    %6 = vector.broadcast %5 : vector<8x1xf32> to vector<8x32xf32>
    %7 = arith.subf %1, %6 : vector<8x32xf32>
    %8 = arith.mulf %7, %7 : vector<8x32xf32>
    %cst_2 = arith.constant dense<0.000000e+00> : vector<8xf32>
    %9 = vector.multi_reduction <add>, %8, %cst_2 [1] : vector<8x32xf32> to vector<8xf32>
    %10 = vector.shape_cast %9 : vector<8xf32> to vector<8x1xf32>
    %cst_3 = arith.constant 3.200000e+01 : f32
    %11 = vector.broadcast %cst_3 : f32 to vector<8x1xf32>
    %12 = arith.divf %10, %11 : vector<8x1xf32>
    %cst_4 = arith.constant 9.99999974E-6 : f32
    %13 = vector.broadcast %cst_4 : f32 to vector<8x1xf32>
    %14 = arith.addf %12, %13 : vector<8x1xf32>
    %15 = math.rsqrt %14 : vector<8x1xf32>
    %16 = vector.broadcast %15 : vector<8x1xf32> to vector<8x32xf32>
    %17 = arith.mulf %7, %16 : vector<8x32xf32>
    %c0_5 = arith.constant 0 : index
    %c0_6 = arith.constant 0 : index
    %18 = vector.load %arg4[%c0_5, %c0_6] : memref<1x32xf32, #tpu.memory_space<vmem>>, vector<1x32xf32>
    %19 = vector.broadcast %18 : vector<1x32xf32> to vector<8x32xf32>
    %20 = arith.mulf %17, %19 : vector<8x32xf32>
    %c0_7 = arith.constant 0 : index
    %c0_8 = arith.constant 0 : index
    %21 = vector.load %arg5[%c0_7, %c0_8] : memref<1x32xf32, #tpu.memory_space<vmem>>, vector<1x32xf32>
    %22 = vector.broadcast %21 : vector<1x32xf32> to vector<8x32xf32>
    %23 = arith.addf %20, %22 : vector<8x32xf32>
    %24 = arith.truncf %23 : vector<8x32xf32> to vector<8x32xbf16>
    %c0_9 = arith.constant 0 : index
    %c0_10 = arith.constant 0 : index
    %25 = vector.load %arg3[%c0_9, %c0_10] : memref<32x128xbf16, #tpu.memory_space<vmem>>, vector<32x128xbf16>
    %cst_11 = arith.constant dense<0.000000e+00> : vector<8x128xf32>
    %26 = tpu.matmul %24, %25, %cst_11 {dimension_numbers = #tpu.dot_dimension_numbers<[1], [0], [0], [1], [0, 0, 1, 1], [], []>} : vector<8x32xbf16>, vector<32x128xbf16>, vector<8x128xf32> -> vector<8x128xf32>
    %c0_12 = arith.constant 0 : index
    %c0_13 = arith.constant 0 : index
    %27 = vector.load %arg6[%c0_12, %c0_13] : memref<1x128xf32, #tpu.memory_space<vmem>>, vector<1x128xf32>
    %28 = vector.broadcast %27 : vector<1x128xf32> to vector<8x128xf32>
    %29 = arith.addf %26, %28 : vector<8x128xf32>
    %cst_14 = arith.constant 5.000000e-01 : f32
    %30 = vector.broadcast %cst_14 : f32 to vector<8x128xf32>
    %31 = arith.mulf %30, %29 : vector<8x128xf32>
    %cst_15 = arith.constant 4.471500e-02 : f32
    %32 = vector.broadcast %cst_15 : f32 to vector<8x128xf32>
    %33 = arith.mulf %32, %29 : vector<8x128xf32>
    %34 = arith.mulf %33, %29 : vector<8x128xf32>
    %35 = arith.mulf %34, %29 : vector<8x128xf32>
    %36 = arith.addf %29, %35 : vector<8x128xf32>
    %cst_16 = arith.constant 0.797884583 : f32
    %37 = vector.broadcast %cst_16 : f32 to vector<8x128xf32>
    %38 = arith.mulf %37, %36 : vector<8x128xf32>
    %39 = math.tanh %38 : vector<8x128xf32>
    %cst_17 = arith.constant 1.000000e+00 : f32
    %40 = vector.broadcast %cst_17 : f32 to vector<8x128xf32>
    %41 = arith.addf %40, %39 : vector<8x128xf32>
    %42 = arith.mulf %31, %41 : vector<8x128xf32>
    %43 = arith.truncf %42 : vector<8x128xf32> to vector<8x128xbf16>
    %c0_18 = arith.constant 0 : index
    %c0_19 = arith.constant 0 : index
    %44 = vector.load %arg7[%c0_18, %c0_19] : memref<8x128xbf16, #tpu.memory_space<vmem>>, vector<8x128xbf16>
    tpu.vector_store %arg7[%c0_18, %c0_19], %43 {strides = array<i32>} : memref<8x128xbf16, #tpu.memory_space<vmem>>, vector<8x128xbf16>,
    return
  }
  func.func @transform_0(%arg0: i32, %arg1: i32) -> (i32, i32) {
    %c0_i32 = arith.constant 0 : i32
    %c0_i32_0 = arith.constant 0 : i32
    return %arg0, %c0_i32 : i32, i32
  }
  func.func @transform_1(%arg0: i32, %arg1: i32) -> (i32, i32) {
    %c0_i32 = arith.constant 0 : i32
    %c0_i32_0 = arith.constant 0 : i32
    return %c0_i32, %arg1 : i32, i32
  }
  func.func @transform_2(%arg0: i32, %arg1: i32) -> (i32, i32) {
    %c0_i32 = arith.constant 0 : i32
    %c0_i32_0 = arith.constant 0 : i32
    %c0_i32_1 = arith.constant 0 : i32
    return %c0_i32, %c0_i32_0 : i32, i32
  }
  func.func @transform_3(%arg0: i32, %arg1: i32) -> (i32, i32) {
    %c0_i32 = arith.constant 0 : i32
    %c0_i32_0 = arith.constant 0 : i32
    %c0_i32_1 = arith.constant 0 : i32
    return %c0_i32, %c0_i32_0 : i32, i32
  }
  func.func @transform_4(%arg0: i32, %arg1: i32) -> (i32, i32) {
    %c0_i32 = arith.constant 0 : i32
    %c0_i32_0 = arith.constant 0 : i32
    return %c0_i32, %arg1 : i32, i32
  }
  func.func @transform_5(%arg0: i32, %arg1: i32) -> (i32, i32) {
    %c0_i32 = arith.constant 0 : i32
    return %arg0, %arg1 : i32, i32
  }
}

module attributes {stable_mosaic.version = 11 : i64} {
  func.func @kernel(%arg0: i32, %arg1: i32, %arg2: memref<8x128xbf16, #tpu.memory_space<vmem>>, %arg3: memref<128x32xbf16, #tpu.memory_space<vmem>>, %arg4: memref<1x32xf32, #tpu.memory_space<vmem>>, %arg5: memref<8x32xbf16, #tpu.memory_space<vmem>>, %arg6: memref<8x32xbf16, #tpu.memory_space<vmem>>) attributes {dimension_semantics = [#tpu.dimension_semantics<parallel>, #tpu.dimension_semantics<parallel>], iteration_bounds = array<i64: 1, 1>, scalar_prefetch = 0 : i64, scratch_operands = 0 : i64, tpu.core_type = #tpu.core_type<tc>, window_params = [{transform_indices = @transform_0, window_bounds = array<i64: 8, 128>}, {transform_indices = @transform_1, window_bounds = array<i64: 128, 32>}, {transform_indices = @transform_2, window_bounds = array<i64: 1, 32>}, {transform_indices = @transform_3, window_bounds = array<i64: 8, 32>}, {transform_indices = @transform_4, window_bounds = array<i64: 8, 32>}]} {
    %c0 = arith.constant 0 : index
    %c0_0 = arith.constant 0 : index
    %0 = vector.load %arg2[%c0, %c0_0] : memref<8x128xbf16, #tpu.memory_space<vmem>>, vector<8x128xbf16>
    %c0_1 = arith.constant 0 : index
    %c0_2 = arith.constant 0 : index
    %1 = vector.load %arg3[%c0_1, %c0_2] : memref<128x32xbf16, #tpu.memory_space<vmem>>, vector<128x32xbf16>
    %cst = arith.constant dense<0.000000e+00> : vector<8x32xf32>
    %2 = tpu.matmul %0, %1, %cst {dimension_numbers = #tpu.dot_dimension_numbers<[1], [0], [0], [1], [0, 0, 1, 1], [], []>} : vector<8x128xbf16>, vector<128x32xbf16>, vector<8x32xf32> -> vector<8x32xf32>
    %c0_3 = arith.constant 0 : index
    %c0_4 = arith.constant 0 : index
    %3 = vector.load %arg4[%c0_3, %c0_4] : memref<1x32xf32, #tpu.memory_space<vmem>>, vector<1x32xf32>
    %4 = vector.broadcast %3 : vector<1x32xf32> to vector<8x32xf32>
    %5 = arith.addf %2, %4 : vector<8x32xf32>
    %c0_5 = arith.constant 0 : index
    %c0_6 = arith.constant 0 : index
    %6 = vector.load %arg5[%c0_5, %c0_6] : memref<8x32xbf16, #tpu.memory_space<vmem>>, vector<8x32xbf16>
    %7 = arith.extf %6 : vector<8x32xbf16> to vector<8x32xf32>
    %8 = arith.addf %5, %7 : vector<8x32xf32>
    %9 = arith.truncf %8 : vector<8x32xf32> to vector<8x32xbf16>
    %c0_7 = arith.constant 0 : index
    %c0_8 = arith.constant 0 : index
    %10 = vector.load %arg6[%c0_7, %c0_8] : memref<8x32xbf16, #tpu.memory_space<vmem>>, vector<8x32xbf16>
    tpu.vector_store %arg6[%c0_7, %c0_8], %9 {strides = array<i32>} : memref<8x32xbf16, #tpu.memory_space<vmem>>, vector<8x32xbf16>,
    return
  }
  func.func @transform_0(%arg0: i32, %arg1: i32) -> (i32, i32) {
    %c0_i32 = arith.constant 0 : i32
    %c0_i32_0 = arith.constant 0 : i32
    return %arg0, %c0_i32 : i32, i32
  }
  func.func @transform_1(%arg0: i32, %arg1: i32) -> (i32, i32) {
    %c0_i32 = arith.constant 0 : i32
    %c0_i32_0 = arith.constant 0 : i32
    return %c0_i32, %arg1 : i32, i32
  }
  func.func @transform_2(%arg0: i32, %arg1: i32) -> (i32, i32) {
    %c0_i32 = arith.constant 0 : i32
    %c0_i32_0 = arith.constant 0 : i32
    return %c0_i32, %arg1 : i32, i32
  }
  func.func @transform_3(%arg0: i32, %arg1: i32) -> (i32, i32) {
    %c0_i32 = arith.constant 0 : i32
    return %arg0, %arg1 : i32, i32
  }
  func.func @transform_4(%arg0: i32, %arg1: i32) -> (i32, i32) {
    %c0_i32 = arith.constant 0 : i32
    return %arg0, %arg1 : i32, i32
  }
}

module attributes {stable_mosaic.version = 11 : i64} {
  func.func @kernel(%arg0: i32, %arg1: i32, %arg2: memref<8x32xbf16, #tpu.memory_space<vmem>>, %arg3: memref<32x128xbf16, #tpu.memory_space<vmem>>, %arg4: memref<1x32xf32, #tpu.memory_space<vmem>>, %arg5: memref<1x32xf32, #tpu.memory_space<vmem>>, %arg6: memref<1x128xf32, #tpu.memory_space<vmem>>, %arg7: memref<8x128xbf16, #tpu.memory_space<vmem>>) attributes {dimension_semantics = [#tpu.dimension_semantics<parallel>, #tpu.dimension_semantics<parallel>], iteration_bounds = array<i64: 1, 1>, scalar_prefetch = 0 : i64, scratch_operands = 0 : i64, tpu.core_type = #tpu.core_type<tc>, window_params = [{transform_indices = @transform_0, window_bounds = array<i64: 8, 32>}, {transform_indices = @transform_1, window_bounds = array<i64: 32, 128>}, {pipeline_mode = #tpu.pipeline_mode<synchronous>, transform_indices = @transform_2, window_bounds = array<i64: 1, 32>}, {pipeline_mode = #tpu.pipeline_mode<synchronous>, transform_indices = @transform_3, window_bounds = array<i64: 1, 32>}, {transform_indices = @transform_4, window_bounds = array<i64: 1, 128>}, {transform_indices = @transform_5, window_bounds = array<i64: 8, 128>}]} {
    %c0 = arith.constant 0 : index
    %c0_0 = arith.constant 0 : index
    %0 = vector.load %arg2[%c0, %c0_0] : memref<8x32xbf16, #tpu.memory_space<vmem>>, vector<8x32xbf16>
    %1 = arith.extf %0 : vector<8x32xbf16> to vector<8x32xf32>
    %cst = arith.constant dense<0.000000e+00> : vector<8xf32>
    %2 = vector.multi_reduction <add>, %1, %cst [1] : vector<8x32xf32> to vector<8xf32>
    %3 = vector.shape_cast %2 : vector<8xf32> to vector<8x1xf32>
    %cst_1 = arith.constant 3.200000e+01 : f32
    %4 = vector.broadcast %cst_1 : f32 to vector<8x1xf32>
    %5 = arith.divf %3, %4 : vector<8x1xf32>
    %6 = vector.broadcast %5 : vector<8x1xf32> to vector<8x32xf32>
    %7 = arith.subf %1, %6 : vector<8x32xf32>
    %8 = arith.mulf %7, %7 : vector<8x32xf32>
    %cst_2 = arith.constant dense<0.000000e+00> : vector<8xf32>
    %9 = vector.multi_reduction <add>, %8, %cst_2 [1] : vector<8x32xf32> to vector<8xf32>
    %10 = vector.shape_cast %9 : vector<8xf32> to vector<8x1xf32>
    %cst_3 = arith.constant 3.200000e+01 : f32
    %11 = vector.broadcast %cst_3 : f32 to vector<8x1xf32>
    %12 = arith.divf %10, %11 : vector<8x1xf32>
    %cst_4 = arith.constant 9.99999974E-6 : f32
    %13 = vector.broadcast %cst_4 : f32 to vector<8x1xf32>
    %14 = arith.addf %12, %13 : vector<8x1xf32>
    %15 = math.rsqrt %14 : vector<8x1xf32>
    %16 = vector.broadcast %15 : vector<8x1xf32> to vector<8x32xf32>
    %17 = arith.mulf %7, %16 : vector<8x32xf32>
    %c0_5 = arith.constant 0 : index
    %c0_6 = arith.constant 0 : index
    %18 = vector.load %arg4[%c0_5, %c0_6] : memref<1x32xf32, #tpu.memory_space<vmem>>, vector<1x32xf32>
    %19 = vector.broadcast %18 : vector<1x32xf32> to vector<8x32xf32>
    %20 = arith.mulf %17, %19 : vector<8x32xf32>
    %c0_7 = arith.constant 0 : index
    %c0_8 = arith.constant 0 : index
    %21 = vector.load %arg5[%c0_7, %c0_8] : memref<1x32xf32, #tpu.memory_space<vmem>>, vector<1x32xf32>
    %22 = vector.broadcast %21 : vector<1x32xf32> to vector<8x32xf32>
    %23 = arith.addf %20, %22 : vector<8x32xf32>
    %24 = arith.truncf %23 : vector<8x32xf32> to vector<8x32xbf16>
    %c0_9 = arith.constant 0 : index
    %c0_10 = arith.constant 0 : index
    %25 = vector.load %arg3[%c0_9, %c0_10] : memref<32x128xbf16, #tpu.memory_space<vmem>>, vector<32x128xbf16>
    %cst_11 = arith.constant dense<0.000000e+00> : vector<8x128xf32>
    %26 = tpu.matmul %24, %25, %cst_11 {dimension_numbers = #tpu.dot_dimension_numbers<[1], [0], [0], [1], [0, 0, 1, 1], [], []>} : vector<8x32xbf16>, vector<32x128xbf16>, vector<8x128xf32> -> vector<8x128xf32>
    %c0_12 = arith.constant 0 : index
    %c0_13 = arith.constant 0 : index
    %27 = vector.load %arg6[%c0_12, %c0_13] : memref<1x128xf32, #tpu.memory_space<vmem>>, vector<1x128xf32>
    %28 = vector.broadcast %27 : vector<1x128xf32> to vector<8x128xf32>
    %29 = arith.addf %26, %28 : vector<8x128xf32>
    %cst_14 = arith.constant 5.000000e-01 : f32
    %30 = vector.broadcast %cst_14 : f32 to vector<8x128xf32>
    %31 = arith.mulf %30, %29 : vector<8x128xf32>
    %cst_15 = arith.constant 4.471500e-02 : f32
    %32 = vector.broadcast %cst_15 : f32 to vector<8x128xf32>
    %33 = arith.mulf %32, %29 : vector<8x128xf32>
    %34 = arith.mulf %33, %29 : vector<8x128xf32>
    %35 = arith.mulf %34, %29 : vector<8x128xf32>
    %36 = arith.addf %29, %35 : vector<8x128xf32>
    %cst_16 = arith.constant 0.797884583 : f32
    %37 = vector.broadcast %cst_16 : f32 to vector<8x128xf32>
    %38 = arith.mulf %37, %36 : vector<8x128xf32>
    %39 = math.tanh %38 : vector<8x128xf32>
    %cst_17 = arith.constant 1.000000e+00 : f32
    %40 = vector.broadcast %cst_17 : f32 to vector<8x128xf32>
    %41 = arith.addf %40, %39 : vector<8x128xf32>
    %42 = arith.mulf %31, %41 : vector<8x128xf32>
    %43 = arith.truncf %42 : vector<8x128xf32> to vector<8x128xbf16>
    %c0_18 = arith.constant 0 : index
    %c0_19 = arith.constant 0 : index
    %44 = vector.load %arg7[%c0_18, %c0_19] : memref<8x128xbf16, #tpu.memory_space<vmem>>, vector<8x128xbf16>
    tpu.vector_store %arg7[%c0_18, %c0_19], %43 {strides = array<i32>} : memref<8x128xbf16, #tpu.memory_space<vmem>>, vector<8x128xbf16>,
    return
  }
  func.func @transform_0(%arg0: i32, %arg1: i32) -> (i32, i32) {
    %c0_i32 = arith.constant 0 : i32
    %c0_i32_0 = arith.constant 0 : i32
    return %arg0, %c0_i32 : i32, i32
  }
  func.func @transform_1(%arg0: i32, %arg1: i32) -> (i32, i32) {
    %c0_i32 = arith.constant 0 : i32
    %c0_i32_0 = arith.constant 0 : i32
    return %c0_i32, %arg1 : i32, i32
  }
  func.func @transform_2(%arg0: i32, %arg1: i32) -> (i32, i32) {
    %c0_i32 = arith.constant 0 : i32
    %c0_i32_0 = arith.constant 0 : i32
    %c0_i32_1 = arith.constant 0 : i32
    return %c0_i32, %c0_i32_0 : i32, i32
  }
  func.func @transform_3(%arg0: i32, %arg1: i32) -> (i32, i32) {
    %c0_i32 = arith.constant 0 : i32
    %c0_i32_0 = arith.constant 0 : i32
    %c0_i32_1 = arith.constant 0 : i32
    return %c0_i32, %c0_i32_0 : i32, i32
  }
  func.func @transform_4(%arg0: i32, %arg1: i32) -> (i32, i32) {
    %c0_i32 = arith.constant 0 : i32
    %c0_i32_0 = arith.constant 0 : i32
    return %c0_i32, %arg1 : i32, i32
  }
  func.func @transform_5(%arg0: i32, %arg1: i32) -> (i32, i32) {
    %c0_i32 = arith.constant 0 : i32
    return %arg0, %arg1 : i32, i32
  }
}

module attributes {stable_mosaic.version = 11 : i64} {
  func.func @_ln_kernel(%arg0: i32, %arg1: memref<8x32xbf16, #tpu.memory_space<vmem>>, %arg2: memref<1x32xf32, #tpu.memory_space<vmem>>, %arg3: memref<1x32xf32, #tpu.memory_space<vmem>>, %arg4: memref<8x32xbf16, #tpu.memory_space<vmem>>) attributes {dimension_semantics = [#tpu.dimension_semantics<parallel>], iteration_bounds = array<i64: 1>, scalar_prefetch = 0 : i64, scratch_operands = 0 : i64, tpu.core_type = #tpu.core_type<tc>, window_params = [{transform_indices = @transform_0, window_bounds = array<i64: 8, 32>}, {pipeline_mode = #tpu.pipeline_mode<synchronous>, transform_indices = @transform_1, window_bounds = array<i64: 1, 32>}, {pipeline_mode = #tpu.pipeline_mode<synchronous>, transform_indices = @transform_2, window_bounds = array<i64: 1, 32>}, {transform_indices = @transform_3, window_bounds = array<i64: 8, 32>}]} {
    %c0 = arith.constant 0 : index
    %c0_0 = arith.constant 0 : index
    %0 = vector.load %arg1[%c0, %c0_0] : memref<8x32xbf16, #tpu.memory_space<vmem>>, vector<8x32xbf16>
    %1 = arith.extf %0 : vector<8x32xbf16> to vector<8x32xf32>
    %cst = arith.constant dense<0.000000e+00> : vector<8xf32>
    %2 = vector.multi_reduction <add>, %1, %cst [1] : vector<8x32xf32> to vector<8xf32>
    %3 = vector.shape_cast %2 : vector<8xf32> to vector<8x1xf32>
    %cst_1 = arith.constant 3.200000e+01 : f32
    %4 = vector.broadcast %cst_1 : f32 to vector<8x1xf32>
    %5 = arith.divf %3, %4 : vector<8x1xf32>
    %6 = vector.broadcast %5 : vector<8x1xf32> to vector<8x32xf32>
    %7 = arith.subf %1, %6 : vector<8x32xf32>
    %8 = arith.mulf %7, %7 : vector<8x32xf32>
    %cst_2 = arith.constant dense<0.000000e+00> : vector<8xf32>
    %9 = vector.multi_reduction <add>, %8, %cst_2 [1] : vector<8x32xf32> to vector<8xf32>
    %10 = vector.shape_cast %9 : vector<8xf32> to vector<8x1xf32>
    %cst_3 = arith.constant 3.200000e+01 : f32
    %11 = vector.broadcast %cst_3 : f32 to vector<8x1xf32>
    %12 = arith.divf %10, %11 : vector<8x1xf32>
    %cst_4 = arith.constant 9.99999974E-6 : f32
    %13 = vector.broadcast %cst_4 : f32 to vector<8x1xf32>
    %14 = arith.addf %12, %13 : vector<8x1xf32>
    %15 = math.rsqrt %14 : vector<8x1xf32>
    %16 = vector.broadcast %15 : vector<8x1xf32> to vector<8x32xf32>
    %17 = arith.mulf %7, %16 : vector<8x32xf32>
    %c0_5 = arith.constant 0 : index
    %c0_6 = arith.constant 0 : index
    %18 = vector.load %arg2[%c0_5, %c0_6] : memref<1x32xf32, #tpu.memory_space<vmem>>, vector<1x32xf32>
    %19 = vector.broadcast %18 : vector<1x32xf32> to vector<8x32xf32>
    %20 = arith.mulf %17, %19 : vector<8x32xf32>
    %c0_7 = arith.constant 0 : index
    %c0_8 = arith.constant 0 : index
    %21 = vector.load %arg3[%c0_7, %c0_8] : memref<1x32xf32, #tpu.memory_space<vmem>>, vector<1x32xf32>
    %22 = vector.broadcast %21 : vector<1x32xf32> to vector<8x32xf32>
    %23 = arith.addf %20, %22 : vector<8x32xf32>
    %24 = arith.truncf %23 : vector<8x32xf32> to vector<8x32xbf16>
    %c0_9 = arith.constant 0 : index
    %c0_10 = arith.constant 0 : index
    %25 = vector.load %arg4[%c0_9, %c0_10] : memref<8x32xbf16, #tpu.memory_space<vmem>>, vector<8x32xbf16>
    tpu.vector_store %arg4[%c0_9, %c0_10], %24 {strides = array<i32>} : memref<8x32xbf16, #tpu.memory_space<vmem>>, vector<8x32xbf16>,
    return
  }
  func.func @transform_0(%arg0: i32) -> (i32, i32) {
    %c0_i32 = arith.constant 0 : i32
    %c0_i32_0 = arith.constant 0 : i32
    return %arg0, %c0_i32 : i32, i32
  }
  func.func @transform_1(%arg0: i32) -> (i32, i32) {
    %c0_i32 = arith.constant 0 : i32
    %c0_i32_0 = arith.constant 0 : i32
    %c0_i32_1 = arith.constant 0 : i32
    return %c0_i32, %c0_i32_0 : i32, i32
  }
  func.func @transform_2(%arg0: i32) -> (i32, i32) {
    %c0_i32 = arith.constant 0 : i32
    %c0_i32_0 = arith.constant 0 : i32
    %c0_i32_1 = arith.constant 0 : i32
    return %c0_i32, %c0_i32_0 : i32, i32
  }
  func.func @transform_3(%arg0: i32) -> (i32, i32) {
    %c0_i32 = arith.constant 0 : i32
    %c0_i32_0 = arith.constant 0 : i32
    return %arg0, %c0_i32 : i32, i32
  }
}

module attributes {stable_mosaic.version = 11 : i64} {
  func.func @kernel(%arg0: i32, %arg1: i32, %arg2: memref<8x32xbf16, #tpu.memory_space<vmem>>, %arg3: memref<8x32xbf16, #tpu.memory_space<vmem>>, %arg4: memref<32x8xbf16, #tpu.memory_space<vmem>>, %arg5: memref<1x8xf32, #tpu.memory_space<vmem>>, %arg6: memref<8x1xf32, #tpu.memory_space<vmem>>, %arg7: memref<8x1xf32, #tpu.memory_space<vmem>>, %arg8: memref<8x8xf32, #tpu.memory_space<vmem>>) attributes {dimension_semantics = [#tpu.dimension_semantics<parallel>, #tpu.dimension_semantics<parallel>], iteration_bounds = array<i64: 1, 1>, scalar_prefetch = 0 : i64, scratch_operands = 0 : i64, tpu.core_type = #tpu.core_type<tc>, window_params = [{transform_indices = @transform_0, window_bounds = array<i64: 8, 32>}, {transform_indices = @transform_1, window_bounds = array<i64: 8, 32>}, {transform_indices = @transform_2, window_bounds = array<i64: 32, 8>}, {transform_indices = @transform_3, window_bounds = array<i64: 1, 8>}, {transform_indices = @transform_4, window_bounds = array<i64: 8, 1>}, {transform_indices = @transform_5, window_bounds = array<i64: 8, 1>}, {transform_indices = @transform_6, window_bounds = array<i64: 8, 8>}]} {
    %c0 = arith.constant 0 : index
    %c0_0 = arith.constant 0 : index
    %0 = vector.load %arg2[%c0, %c0_0] : memref<8x32xbf16, #tpu.memory_space<vmem>>, vector<8x32xbf16>
    %1 = arith.extf %0 : vector<8x32xbf16> to vector<8x32xf32>
    %c0_1 = arith.constant 0 : index
    %c0_2 = arith.constant 0 : index
    %2 = vector.load %arg3[%c0_1, %c0_2] : memref<8x32xbf16, #tpu.memory_space<vmem>>, vector<8x32xbf16>
    %3 = arith.extf %2 : vector<8x32xbf16> to vector<8x32xf32>
    %4 = arith.addf %1, %3 : vector<8x32xf32>
    %5 = arith.truncf %4 : vector<8x32xf32> to vector<8x32xbf16>
    %c0_3 = arith.constant 0 : index
    %c0_4 = arith.constant 0 : index
    %6 = vector.load %arg4[%c0_3, %c0_4] : memref<32x8xbf16, #tpu.memory_space<vmem>>, vector<32x8xbf16>
    %cst = arith.constant dense<0.000000e+00> : vector<8x8xf32>
    %7 = tpu.matmul %5, %6, %cst {dimension_numbers = #tpu.dot_dimension_numbers<[1], [0], [0], [1], [0, 0, 1, 1], [], []>} : vector<8x32xbf16>, vector<32x8xbf16>, vector<8x8xf32> -> vector<8x8xf32>
    %c0_5 = arith.constant 0 : index
    %c0_6 = arith.constant 0 : index
    %8 = vector.load %arg5[%c0_5, %c0_6] : memref<1x8xf32, #tpu.memory_space<vmem>>, vector<1x8xf32>
    %9 = vector.broadcast %8 : vector<1x8xf32> to vector<8x8xf32>
    %10 = arith.addf %7, %9 : vector<8x8xf32>
    %c0_7 = arith.constant 0 : index
    %c0_8 = arith.constant 0 : index
    %11 = vector.load %arg6[%c0_7, %c0_8] : memref<8x1xf32, #tpu.memory_space<vmem>>, vector<8x1xf32>
    %12 = vector.broadcast %11 : vector<8x1xf32> to vector<8x8xf32>
    %13 = arith.mulf %10, %12 : vector<8x8xf32>
    %c0_9 = arith.constant 0 : index
    %c0_10 = arith.constant 0 : index
    %14 = vector.load %arg7[%c0_9, %c0_10] : memref<8x1xf32, #tpu.memory_space<vmem>>, vector<8x1xf32>
    %15 = vector.broadcast %14 : vector<8x1xf32> to vector<8x8xf32>
    %16 = arith.addf %13, %15 : vector<8x8xf32>
    %c0_11 = arith.constant 0 : index
    %c0_12 = arith.constant 0 : index
    %17 = vector.load %arg8[%c0_11, %c0_12] : memref<8x8xf32, #tpu.memory_space<vmem>>, vector<8x8xf32>
    tpu.vector_store %arg8[%c0_11, %c0_12], %16 {strides = array<i32>} : memref<8x8xf32, #tpu.memory_space<vmem>>, vector<8x8xf32>,
    return
  }
  func.func @transform_0(%arg0: i32, %arg1: i32) -> (i32, i32) {
    %c0_i32 = arith.constant 0 : i32
    %c0_i32_0 = arith.constant 0 : i32
    return %arg0, %c0_i32 : i32, i32
  }
  func.func @transform_1(%arg0: i32, %arg1: i32) -> (i32, i32) {
    %c0_i32 = arith.constant 0 : i32
    %c0_i32_0 = arith.constant 0 : i32
    return %arg0, %c0_i32 : i32, i32
  }
  func.func @transform_2(%arg0: i32, %arg1: i32) -> (i32, i32) {
    %c0_i32 = arith.constant 0 : i32
    %c0_i32_0 = arith.constant 0 : i32
    return %c0_i32, %arg1 : i32, i32
  }
  func.func @transform_3(%arg0: i32, %arg1: i32) -> (i32, i32) {
    %c0_i32 = arith.constant 0 : i32
    %c0_i32_0 = arith.constant 0 : i32
    return %c0_i32, %arg1 : i32, i32
  }
  func.func @transform_4(%arg0: i32, %arg1: i32) -> (i32, i32) {
    %c0_i32 = arith.constant 0 : i32
    %c0_i32_0 = arith.constant 0 : i32
    return %arg0, %c0_i32 : i32, i32
  }
  func.func @transform_5(%arg0: i32, %arg1: i32) -> (i32, i32) {
    %c0_i32 = arith.constant 0 : i32
    %c0_i32_0 = arith.constant 0 : i32
    return %arg0, %c0_i32 : i32, i32
  }
  func.func @transform_6(%arg0: i32, %arg1: i32) -> (i32, i32) {
    %c0_i32 = arith.constant 0 : i32
    return %arg0, %arg1 : i32, i32
  }
}

module attributes {stable_mosaic.version = 11 : i64} {
  func.func @_time_proj_kernel(%arg0: i32, %arg1: i32, %arg2: memref<1x8x32xbf16, #tpu.memory_space<vmem>>, %arg3: memref<1x32x32xbf16, #tpu.memory_space<vmem>>, %arg4: memref<1x8x32xf32, #tpu.memory_space<vmem>>) attributes {dimension_semantics = [#tpu.dimension_semantics<parallel>, #tpu.dimension_semantics<parallel>], iteration_bounds = array<i64: 3, 1>, scalar_prefetch = 0 : i64, scratch_operands = 0 : i64, tpu.core_type = #tpu.core_type<tc>, window_params = [{transform_indices = @transform_0, window_bounds = array<i64: 1, 8, 32>}, {transform_indices = @transform_1, window_bounds = array<i64: 1, 32, 32>}, {transform_indices = @transform_2, window_bounds = array<i64: 1, 8, 32>}]} {
    %c0 = arith.constant 0 : index
    %c0_0 = arith.constant 0 : index
    %c0_1 = arith.constant 0 : index
    %0 = vector.load %arg2[%c0, %c0_0, %c0_1] : memref<1x8x32xbf16, #tpu.memory_space<vmem>>, vector<1x8x32xbf16>
    %1 = vector.shape_cast %0 : vector<1x8x32xbf16> to vector<8x32xbf16>
    %c0_2 = arith.constant 0 : index
    %c0_3 = arith.constant 0 : index
    %c0_4 = arith.constant 0 : index
    %2 = vector.load %arg3[%c0_2, %c0_3, %c0_4] : memref<1x32x32xbf16, #tpu.memory_space<vmem>>, vector<1x32x32xbf16>
    %3 = vector.shape_cast %2 : vector<1x32x32xbf16> to vector<32x32xbf16>
    %cst = arith.constant dense<0.000000e+00> : vector<8x32xf32>
    %4 = tpu.matmul %1, %3, %cst {dimension_numbers = #tpu.dot_dimension_numbers<[1], [0], [0], [1], [0, 0, 1, 1], [], []>} : vector<8x32xbf16>, vector<32x32xbf16>, vector<8x32xf32> -> vector<8x32xf32>
    %c0_5 = arith.constant 0 : index
    %c0_6 = arith.constant 0 : index
    %c0_7 = arith.constant 0 : index
    %5 = vector.load %arg4[%c0_5, %c0_6, %c0_7] : memref<1x8x32xf32, #tpu.memory_space<vmem>>, vector<1x8x32xf32>
    %6 = vector.shape_cast %5 : vector<1x8x32xf32> to vector<8x32xf32>
    %7 = vector.shape_cast %4 : vector<8x32xf32> to vector<1x8x32xf32>
    tpu.vector_store %arg4[%c0_5, %c0_6, %c0_7], %7 {strides = array<i32>} : memref<1x8x32xf32, #tpu.memory_space<vmem>>, vector<1x8x32xf32>,
    return
  }
  func.func @transform_0(%arg0: i32, %arg1: i32) -> (i32, i32, i32) {
    %c0_i32 = arith.constant 0 : i32
    %c0_i32_0 = arith.constant 0 : i32
    return %arg0, %arg1, %c0_i32 : i32, i32, i32
  }
  func.func @transform_1(%arg0: i32, %arg1: i32) -> (i32, i32, i32) {
    %c0_i32 = arith.constant 0 : i32
    %c0_i32_0 = arith.constant 0 : i32
    %c0_i32_1 = arith.constant 0 : i32
    return %arg0, %c0_i32, %c0_i32_0 : i32, i32, i32
  }
  func.func @transform_2(%arg0: i32, %arg1: i32) -> (i32, i32, i32) {
    %c0_i32 = arith.constant 0 : i32
    %c0_i32_0 = arith.constant 0 : i32
    return %arg0, %arg1, %c0_i32 : i32, i32, i32
  }
}

</mosaic_0001>

<bundles_post_ra>
// kernel: model_forward.15
= control target key start
LH: loop header
LB: loop body
LE: loop exit
PB: predicated region body
PF: predicated region fallthrough
CT: control target
= control target key end

     0   :  { %vm23_vm0 = vcmask 261120   ;;  %v126_v3 = vmov 32.0   ;;  %vm101_vm5 = vcmask 781312   ;;  %s181_s0 = inlined_call_operand.vmem [shape: bf16[8,32], index: 0, kind: input, shape index: {}]   ;;  %s182_s2 = inlined_call_operand.vmem [shape: f32[1,32], index: 2, kind: input, shape index: {}]   ;;  %s183_s3 = inlined_call_operand.vmem [shape: f32[1,32], index: 3, kind: input, shape index: {}]   ;;  %s184_s4 = inlined_call_operand.vmem [shape: f32[1,96], index: 4, kind: input, shape index: {}]   ;;  %s185_s1 = inlined_call_operand.vmem [shape: bf16[32,96], index: 1, kind: input, shape index: {}]   ;;  %s186_s5 = inlined_call_operand.vmem [shape: bf16[8,96], index: 5, kind: output, shape index: {}]  }
   0x1   :  { %v21_v0 = vld [vmem:[%s181_s0] sm:$0xf]  ;;  %122 = vrcp.f32 %v126_v3  ;;  %v117_v15 = vld [vmem:[%s185_s1 + $0x8] sm:$0xff] }
   0x2   :  { %v22_v1 = vunpack.c.l.bf16 %v21_v0  ;;  %93 = vmatpush.bf16.msra.mxu0 %v117_v15  ;;  %v116_v16 = vld [vmem:[%s185_s1] sm:$0xff] }
   0x3   :  { %v119_v26 = vld [vmem:[%s182_s2] ss:$0 sm:$0xff] }
   0x4   :  { %v24_v2 = vsel %vm23_vm0, %v22_v1, 0.0  ;;  %v120_v29 = vld [vmem:[%s183_s3] ss:$0 sm:$0xff] }
   0x5   :  { %25 = vadd.xlane.f32.xlu0 %v24_v2  ;;  %v121_v33 = vld [vmem:[%s184_s4] ss:$0 sm:$0xff] }
   0x6   :  { %94 = vmatpush.bf16.msra.mxu0 %v116_v16 }
   0x7   :  { %v123_v4 = vpop.eup %122 }
   0x8   :  { %v28_v5 = vmul.f32 32.0, %v123_v4  ;;  %vm32_vm1 = vweird.f32 %v123_v4 }
   0xa   :  { %v29_v6 = vsub.f32 1.0, %v28_v5 }
   0xc   :  { %v30_v7 = vmul.f32 %v123_v4, %v29_v6 }
   0xe   :  { %v31_v8 = vadd.f32 %v123_v4, %v30_v7 }
  0x10   :  { %v33_v9 = vsel %vm32_vm1, %v123_v4, %v31_v8 }
  0x78   :  { %v26_v10 = vpop.xlane.xlu0 %25 }
  0x79   :  { %v34_v11 = vmul.f32 %v33_v9, %v26_v10 }
  0x7b   :  { %v35_v12 = vsub.f32 %v22_v1, %v34_v11 }
  0x7d   :  { %v36_v13 = vmul.f32 %v35_v12, %v35_v12 }
  0x7f   :  { %v37_v14 = vsel %vm23_vm0, %v36_v13, 0.0 }
  0x80   :  { %38 = vadd.xlane.f32.xlu0 %v37_v14 }
  0xf3   :  { %v39_v17 = vpop.xlane.xlu0 %38 }
  0xf4   :  { %v40_v18 = vmul.f32 %v39_v17, %v33_v9 }
  0xf6   :  { %v41_v19 = vadd.f32 1e-05, %v40_v18 }
  0xf8   :  { %124 = vrsqrt.f32 %v41_v19  ;;  %vm48_vm3 = vweird.f32 %v41_v19 }
  0xfe   :  { %v125_v20 = vpop.eup %124 }
  0xff   :  { %v43_v21 = vmul.f32 %v125_v20, %v41_v19  ;;  %vm49_vm2 = vweird.f32 %v125_v20 }
 0x100   :  { %vm50_vm4 = vmor %vm48_vm3, %vm49_vm2 }
 0x101   :  { %v44_v22 = vmul.f32 %v125_v20, %v43_v21 }
 0x103   :  { %v45_v23 = vmul.f32 0.5, %v44_v22 }
 0x105   :  { %v46_v24 = vsub.f32 1.5, %v45_v23 }
 0x107   :  { %v47_v25 = vmul.f32 %v125_v20, %v46_v24 }
 0x109   :  { %v51_v27 = vsel %vm50_vm4, %v125_v20, %v47_v25 }
 0x10a   :  { %v52_v28 = vmul.f32 %v51_v27, %v35_v12 }
 0x10c   :  { %v57_v30 = vmul.f32 %v119_v26, %v52_v28 }
 0x10e   :  { %v62_v31 = vadd.f32 %v120_v29, %v57_v30 }
 0x110   :  { %v63_v32 = vpack.c.bf16 %v62_v31, %v62_v31 }
 0x112   :  { %115 = vmatmul.msk.bf16.vlgmr.msra.gmra.mxu0 %vm23_vm0, %v63_v32 }
 0x18f   :  { %v96_v34 = vpop.f32.mrf.mxu0 }
 0x190   :  { %v97_v35 = vadd.f32 %v121_v33, %v96_v34 }
 0x192   :  { %v100_v36 = vpack.c.bf16 %v97_v35, %v97_v35 }
 0x194   :  { %102 = vst.msk [vmem:[%s186_s5] sm:$0xf] %vm101_vm5, %v100_v36 }
 0x197   :  { %v98_v37 = vpop.f32.mrf.mxu0 }

// kernel: model_forward.14
= control target key start
LH: loop header
LB: loop body
LE: loop exit
PB: predicated region body
PF: predicated region fallthrough
CT: control target
= control target key end

     0   :  { %s526_s18 = smov 0   ;;  %s567_s0 = inlined_call_operand.vmem [shape: f32[2,16,4], index: 0, kind: input, shape index: {}]   ;;  %s568_s1 = inlined_call_operand.vmem [shape: bf16[16,32], index: 1, kind: input, shape index: {}]   ;;  %s569_s2 = inlined_call_operand.vmem [shape: f32[1,32], index: 2, kind: input, shape index: {}]   ;;  %s570_s3 = inlined_call_operand.vmem [shape: bf16[2,4,32], index: 3, kind: output, shape index: {0}]   ;;  %s571_s4 = inlined_call_operand.vmem [shape: f32[2,1,4], index: 4, kind: output, shape index: {1}]   ;;  %s572_s5 = inlined_call_operand.vmem [shape: f32[2,1,4], index: 5, kind: output, shape index: {2}]  }
   0x1 LB: > { %s455_s19 = sadd.s32 4294967295, %s493_s18   ;;  %p459_p0 = scmp.ge.s32.totalorder %s493_s18, 1  ;;  %s493_s18 = sphi %s526_s18, %s16_s18  }
   0x2   : > { %p192_p1 = scmp.lt.s32.totalorder %s493_s18, 3 }
   0x4   : > { %p193_p2 = pnand %p459_p0, %p192_p1 }
   0x5   : > { %p225_p3 = scmp.lt.s32.totalorder (!%p193_p2), %s455_s19, 1 }
   0x6   : > { %196 = sbr.rel (%p193_p2) target bundleno = 384 (0x180), region = 32 }
   0xb   : > { %v495_v0 = vmov 16.0   ;;  %s574_s19 = smov (!%p225_p3, %s455_s19), 1  ;;  %vm243_vm0 = vcmask 31744   ;;  %vm337_vm2 = vcmask 24576   ;;  %v471_v30 = vld [vmem:[%s568_s1] sm:$0xff]  ;;  %vm317_vm8 = vcmask 130048  }
   0xc   : > { %483 = vrcp.f32 %v495_v0  ;;  %s470_s20 = sshll.u32 %s574_s19, 4  ;;  %s236_s26 = scalar_lea.vmem %s571_s4, %s574_s19  ;;  %328 = vmatpush.bf16.msra.mxu0 %v471_v30  ;;  %v482_v50 = vld [vmem:[%s569_s2] ss:$0 sm:$0xff]  ;;  %vm335_vm9 = vcmask 254976  }
   0xd   : > { %s229_s23 = scalar_lea.vmem %s567_s0, %s470_s20  ;;  %s239_s6 = scalar_lea.vmem %s572_s5, %s574_s19 }
   0xe   : > { %v241_v1 = vld [vmem:[%s229_s23] sm:$0xff]  ;;  %v242_v2 = vld [vmem:[%s229_s23 + $0x8] sm:$0xff]  ;;  %s462_s9 = sshll.u32 %s574_s19, 1 }
   0xf   : > { %v244_v4 = vsel %vm243_vm0, %v241_v1, 0.0  ;;  %v245_v5 = vsel %vm243_vm0, %v242_v2, 0.0  ;;  %s233_s12 = scalar_lea.vmem %s570_s3, %s462_s9 }
  0x10   : > { %v246_v6 = vadd.f32 %v245_v5, %v244_v4 }
  0x12   : > { %v484_v3 = vpop.eup %483  ;;  %v247_v8 = vrot.slane %v246_v6, 4 }
  0x13   : > { %v254_v7 = vmul.f32 16.0, %v484_v3  ;;  %vm258_vm1 = vweird.f32 %v484_v3 }
  0x14   : > { %v248_v10 = vadd.f32 %v247_v8, %v246_v6 }
  0x15   : > { %v255_v9 = vsub.f32 1.0, %v254_v7 }
  0x16   : > { %v249_v12 = vrot.slane %v248_v10, 2 }
  0x17   : > { %v256_v11 = vmul.f32 %v484_v3, %v255_v9 }
  0x18   : > { %v250_v14 = vadd.f32 %v249_v12, %v248_v10 }
  0x19   : > { %v257_v13 = vadd.f32 %v484_v3, %v256_v11 }
  0x1a   : > { %v251_v15 = vrot.slane %v250_v14, 1 }
  0x1b   : > { %v259_v16 = vsel %vm258_vm1, %v484_v3, %v257_v13 }
  0x1c   : > { %v252_v17 = vadd.f32 %v251_v15, %v250_v14 }
  0x1e   : > { %v260_v18 = vmul.f32 %v259_v16, %v252_v17 }
  0x20   : > { %v261_v19 = vsub.f32 %v241_v1, %v260_v18  ;;  %v262_v20 = vsub.f32 %v242_v2, %v260_v18  ;;  %338 = vst.msk [vmem:[%s236_s26] sm:$0x1] %vm337_vm2, %v260_v18 }
  0x22   : > { %v263_v21 = vmul.f32 %v261_v19, %v261_v19  ;;  %v264_v22 = vmul.f32 %v262_v20, %v262_v20 }
  0x24   : > { %v265_v23 = vsel %vm243_vm0, %v263_v21, 0.0  ;;  %v266_v24 = vsel %vm243_vm0, %v264_v22, 0.0 }
  0x25   : > { %v267_v25 = vadd.f32 %v266_v24, %v265_v23 }
  0x27   : > { %v268_v26 = vrot.slane %v267_v25, 4 }
  0x29   : > { %v269_v27 = vadd.f32 %v268_v26, %v267_v25 }
  0x2b   : > { %v270_v28 = vrot.slane %v269_v27, 2 }
  0x2d   : > { %v271_v29 = vadd.f32 %v270_v28, %v269_v27 }
  0x2f   : > { %v272_v31 = vrot.slane %v271_v29, 1 }
  0x31   : > { %v273_v32 = vadd.f32 %v272_v31, %v271_v29 }
  0x33   : > { %v274_v33 = vmul.f32 %v273_v32, %v259_v16 }
  0x35   : > { %v275_v34 = vadd.f32 1e-05, %v274_v33 }
  0x37   : > { %485 = vrsqrt.f32 %v275_v34  ;;  %vm282_vm3 = vweird.f32 %v275_v34  ;;  %vm346_vm6 = vcmp.eq.f32.partialorder %v275_v34, inf  ;;  %v349_v41 = vand.u32 2147483648, %v275_v34 }
  0x38   : > { %vm348_vm7 = vcmp.eq.f32.partialorder %v275_v34, 0.0 }
  0x3d   : > { %v486_v35 = vpop.eup %485 }
  0x3e   : > { %v277_v36 = vmul.f32 %v486_v35, %v275_v34  ;;  %vm283_vm4 = vweird.f32 %v486_v35 }
  0x3f   : > { %vm284_vm5 = vmor %vm282_vm3, %vm283_vm4 }
  0x40   : > { %v278_v37 = vmul.f32 %v486_v35, %v277_v36 }
  0x42   : > { %v279_v38 = vmul.f32 0.5, %v278_v37 }
  0x44   : > { %v280_v39 = vsub.f32 1.5, %v279_v38 }
  0x46   : > { %v281_v40 = vmul.f32 %v486_v35, %v280_v39 }
  0x48   : > { %v285_v42 = vsel %vm284_vm5, %v486_v35, %v281_v40  ;;  %v345_v43 = vmul.f32 %v281_v40, %v275_v34 }
  0x49   : > { %v286_v44 = vmul.f32 %v285_v42, %v261_v19  ;;  %v287_v45 = vmul.f32 %v285_v42, %v262_v20 }
  0x4a   : > { %v347_v46 = vsel %vm346_vm6, %v275_v34, %v345_v43 }
  0x4b   : > { %v288_v47 = vpack.c.bf16 %v287_v45, %v286_v44  ;;  %v350_v48 = vsel %vm348_vm7, %v349_v41, %v347_v46 }
  0x4c   : > { %351 = vst.msk [vmem:[%s239_s6] sm:$0x1] %vm337_vm2, %v350_v48 }
  0x4d   : > { %295 = vxpose.xlu0.c.b16.start.end [1/1] (short) (narrow) %v288_v47, 16 }
  0xf9   : > { %v303_v49 = vpop.trf.xlu0 }
  0xfa   : > { %467 = vmatmul.msk.bf16.vlgmr.msra.gmra.mxu0 %vm317_vm8, %v303_v49 }
 0x177   : > { %v330_v51 = vpop.f32.mrf.mxu0 }
 0x178   : > { %v331_v52 = vadd.f32 %v482_v50, %v330_v51 }
 0x17a   : > { %v334_v53 = vpack.c.bf16 %v331_v52, %v331_v52 }
 0x17c   : > { %336 = vst.msk [vmem:[%s233_s12] sm:$0x3] %vm335_vm9, %v334_v53 }
 0x17f   : > { %v332_v54 = vpop.f32.mrf.mxu0 }
 0x180 PF: > { %s16_s18 = sadd.s32 1, %s493_s18  }
 0x181   : > { %p13_p4 = scmp.ge.s32.totalorder %s16_s18, 4  }
 0x183   :  { %15 = sbr.rel (!%p13_p4) target bundleno = 1 (0x1), region = 86 }

// kernel: model_forward.17
= control target key start
LH: loop header
LB: loop body
LE: loop exit
PB: predicated region body
PF: predicated region fallthrough
CT: control target
= control target key end

     0   :  { %vm39_vm0 = vcmask 261120   ;;  %vm60_vm1 = vcmask 257024   ;;  %s121_s1 = inlined_call_operand.vmem [shape: bf16[32,32], index: 1, kind: input, shape index: {}]   ;;  %s122_s2 = inlined_call_operand.vmem [shape: f32[1,32], index: 2, kind: input, shape index: {}]   ;;  %s123_s0 = inlined_call_operand.vmem [shape: bf16[8,32], index: 0, kind: input, shape index: {}]   ;;  %s124_s3 = inlined_call_operand.vmem [shape: bf16[8,32], index: 3, kind: input, shape index: {}]   ;;  %s125_s4 = inlined_call_operand.vmem [shape: bf16[8,32], index: 4, kind: output, shape index: {}]  }
   0x1   :  { %v76_v0 = vld [vmem:[%s121_s1 + $0x8] sm:$0xff]  ;;  %v75_v1 = vld [vmem:[%s121_s1] sm:$0xff] }
   0x2   :  { %49 = vmatpush.bf16.msra.mxu0 %v76_v0  ;;  %v18_v2 = vld [vmem:[%s123_s0] sm:$0xf] }
   0x3   :  { %v56_v3 = vld [vmem:[%s124_s3] sm:$0xf] }
   0x4   :  { %v77_v4 = vld [vmem:[%s122_s2] ss:$0 sm:$0xff]  ;;  %v57_v5 = vunpack.c.l.bf16 %v56_v3 }
   0x6   :  { %50 = vmatpush.bf16.msra.mxu0 %v75_v1 }
   0x9   :  { %74 = vmatmul.msk.bf16.vlgmr.msra.gmra.mxu0 %vm39_vm0, %v18_v2 }
  0x86   :  { %v52_v6 = vpop.f32.mrf.mxu0 }
  0x87   :  { %v53_v7 = vadd.f32 %v77_v4, %v52_v6 }
  0x89   :  { %v58_v8 = vadd.f32 %v57_v5, %v53_v7 }
  0x8b   :  { %v59_v9 = vpack.c.bf16 %v58_v8, %v58_v8 }
  0x8d   :  { %61 = vst.msk [vmem:[%s125_s4] sm:$0xf] %vm60_vm1, %v59_v9 }
  0x8e   :  { %v54_v10 = vpop.f32.mrf.mxu0 }

// kernel: model_forward.16
= control target key start
LH: loop header
LB: loop body
LE: loop exit
PB: predicated region body
PF: predicated region fallthrough
CT: control target
= control target key end

     0   :  { %s568_s6 = smov 0   ;;  %s637_s0 = inlined_call_operand.vmem [shape: bf16[2,4,96], index: 0, kind: input, shape index: {}]   ;;  %s638_s1 = inlined_call_operand.vmem [shape: bf16[2,4,32], index: 1, kind: output, shape index: {}]  }
   0x1 LB: > { %s479_s7 = sadd.s32 4294967295, %s541_s6   ;;  %p483_p0 = scmp.ge.s32.totalorder %s541_s6, 1  ;;  %s541_s6 = sphi %s568_s6, %s11_s6  }
   0x2   : > { %p86_p1 = scmp.lt.s32.totalorder %s541_s6, 3 }
   0x4   : > { %p87_p2 = pnand %p483_p0, %p86_p1 }
   0x5   : > { %p104_p3 = scmp.lt.s32.totalorder (!%p87_p2), %s479_s7, 1  ;;  %s543_s12 = smov (!%p87_p2), 96  }
   0x6   : > { %90 = sbr.rel (%p87_p2) target bundleno = 1207 (0x4b7), region = 24  ;;  %s544_s13 = smov (!%p87_p2), 88  }
   0x7   : > { %s545_s14 = smov (!%p87_p2), 120   ;;  %s546_s15 = smov (!%p87_p2), 64  }
   0x8   : > { %s547_s16 = smov (!%p87_p2), 80   ;;  %s549_s17 = smov (!%p87_p2), 72  }
   0x9   : > { %s550_s18 = smov (!%p87_p2), 112   ;;  %s551_s19 = smov (!%p87_p2), 104  }
   0xa   : > { %s552_s20 = smov (!%p87_p2), 56   ;;  %s553_s24 = smov (!%p87_p2), 40  }
   0xb   : > { %s640_s7 = smov (!%p104_p3, %s479_s7), 1  ;;  %vm126_vm0 = vcmask 64512   ;;  %v114_v13 = vlaneseq  ;;  %v548_v19 = vmov -1e+30   ;;  %vm147_vm2 = vcmask 27648   ;;  %s554_s25 = smov 48  }
   0xc   : > { %s484_s8 = sshll.u32 %s640_s7, 1  ;;  %vm169_vm3 = vcmask 1041408   ;;  %vm165_vm4 = vcmask 31744   ;;  %vm187_vm5 = vcmask 58368   ;;  %s555_s26 = smov 8   ;;  %vm266_vm6 = vcmask 123968  }
   0xd   : > { %s107_s11 = scalar_lea.vmem %s637_s0, %s484_s8  ;;  %v115_v16 = vshrl.u32 %v114_v13, 7  ;;  %v117_v17 = vand.u32 127, %v114_v13  ;;  %s613_s23 = scalar_lea.vmem %s638_s1, %s484_s8  ;;  %vm345_vm7 = vcmask 189568   ;;  %vm424_vm8 = vcmask 255168  }
   0xe   : > { %v113_v0 = vld [vmem:[%s107_s11] sm:$0x3]  ;;  %s556_s27 = smov 16   ;;  %s557_s28 = smov 24  }
   0xf   : > { %121 = vst [vmem:[#allocation1] ss:$4 sm:$0xff] %v113_v0  ;;  %vm118_vm1 = vcmp.le.s32.totalorder %v117_v17, %v115_v16 }
  0x10   : > { %v592_v20 = vsel %vm118_vm1, 0.0, %v548_v19 }
  0x16   : > { %v122_v1 = vld.sshfl [vmem:[#allocation1] sm:$0xff pattern:$0x73625140] }
  0x17   : > { %124 = vrot.lane.b32.xlu0 %v122_v1, %s543_s12  ;;  %160 = vst [vmem:[#allocation1] ss:$4 sm:$0xff] %v113_v0 }
  0x1e   : > { %v161_v2 = vld.sshfl [vmem:[#allocation1] sm:$0xff pattern:$0x73625140] }
  0x1f   : > { %189 = vst [vmem:[#allocation1] ss:$4 sm:$0xff] %v113_v0 }
  0x26   : > { %v190_v3 = vld.sshfl [vmem:[#allocation1] sm:$0xff pattern:$0x73625140] }
  0x27   : > { %194 = vst [vmem:[#allocation1] ss:$4 sm:$0xff] %v113_v0  ;;  %192 = vrot.lane.b32.xlu2 %v190_v3, %s545_s14 }
  0x2e   : > { %v195_v4 = vld.sshfl [vmem:[#allocation1] sm:$0xff pattern:$0x73625140] }
  0x2f   : > { %197 = vrot.lane.b32.xlu1 %v195_v4, %s544_s13  ;;  %232 = vst [vmem:[#allocation1] ss:$4 sm:$0xff] %v113_v0  ;;  %163 = vrot.lane.b32.xlu2 %v161_v2, %s546_s15 }
  0x36   : > { %v585_v7 = vld.sshfl [vmem:[#allocation1] sm:$0xff pattern:$0x73625140] }
  0x37   : > { %268 = vst [vmem:[#allocation1] ss:$4 sm:$0xff] %v113_v0 }
  0x3e   : > { %v269_v8 = vld.sshfl [vmem:[#allocation1] sm:$0xff pattern:$0x73625140] }
  0x3f   : > { %273 = vst [vmem:[#allocation1] ss:$4 sm:$0xff] %v113_v0 }
  0x46   : > { %v274_v9 = vld.sshfl [vmem:[#allocation1] sm:$0xff pattern:$0x73625140] }
  0x47   : > { %276 = vrot.lane.b32.xlu2 %v274_v9, %s547_s16  ;;  %311 = vst [vmem:[#allocation1] ss:$4 sm:$0xff] %v113_v0 }
  0x4e   : > { %v588_v10 = vld.sshfl [vmem:[#allocation1] sm:$0xff pattern:$0x73625140] }
  0x4f   : > { %347 = vst [vmem:[#allocation1] ss:$4 sm:$0xff] %v113_v0 }
  0x56   : > { %v348_v15 = vld.sshfl [vmem:[#allocation1] sm:$0xff pattern:$0x73625140] }
  0x57   : > { %352 = vst [vmem:[#allocation1] ss:$4 sm:$0xff] %v113_v0 }
  0x5e   : > { %v353_v21 = vld.sshfl [vmem:[#allocation1] sm:$0xff pattern:$0x73625140] }
  0x5f   : > { %355 = vrot.lane.b32.xlu2 %v353_v21, %s549_s17  ;;  %390 = vst [vmem:[#allocation1] ss:$4 sm:$0xff] %v113_v0 }
  0x66   : > { %v391_v55 = vld.sshfl [vmem:[#allocation1] sm:$0xff pattern:$0x73625140] }
  0x67   : > { %271 = vrot.lane.b32.xlu2 %v269_v8, %s550_s18 }
  0x6f   : > { %350 = vrot.lane.b32.xlu2 %v348_v15, %s551_s19 }
  0x81   : > { %v193_v14 = vpop.permute.xlu2 %192 }
  0x89   : > { %v125_v5 = vpop.permute.xlu0 %124  ;;  %v164_v26 = vpop.permute.xlu2 %163 }
  0x8a   : > { %v130_v6 = vsel %vm126_vm0, %v125_v5, 0  ;;  %v171_v31 = vsel %vm169_vm3, %v164_v26, 0 }
  0x8b   : > { %139 = vmatpush.bf16.xpose.msra.mxu0 %v130_v6  ;;  %180 = vmatpush.bf16.msra.mxu1 %v171_v31 }
  0x92   : > { %486 = vmatmul.msk.bf16.vlgmr.msra.gmra.mxu0 %vm126_vm0, %v113_v0 }
  0xa1   : > { %v198_v11 = vpop.permute.xlu1 %197  ;;  %v277_v27 = vpop.permute.xlu2 %276 }
  0xa2   : > { %v203_v12 = vsel %vm126_vm0, %v198_v11, 0  ;;  %v282_v29 = vsel %vm126_vm0, %v277_v27, 0 }
  0xa3   : > { %212 = vmatpush.bf16.xpose.msra.mxu2 %v203_v12  ;;  %291 = vmatpush.bf16.xpose.msrb.mxu1 %v282_v29 }
  0xaa   : > { %488 = vmatmul.msk.bf16.vlgmr.msra.gmra.mxu2 %vm126_vm0, %v193_v14 }
  0xb9   : > { %v356_v28 = vpop.permute.xlu2 %355 }
  0xba   : > { %v361_v30 = vsel %vm126_vm0, %v356_v28, 0 }
  0xbb   : > { %370 = vmatpush.bf16.xpose.msrb.mxu0 %v361_v30 }
  0xc1   : > { %v272_v32 = vpop.permute.xlu2 %271 }
  0xc9   : > { %v351_v33 = vpop.permute.xlu2 %350 }
  0xca   : > { %492 = vmatmul.msk.bf16.vlgmr.msrb.gmra.mxu0 %vm126_vm0, %v351_v33 }
 0x10f   : > { %v141_v18 = vpop.f32.mrf.mxu0 }
 0x110   : > { %v145_v22 = vmul.f32 0.35355338, %v141_v18 }
 0x112   : > { %v146_v23 = vadd.f32 %v145_v22, %v592_v20 }
 0x114   : > { %v148_v24 = vsel %vm147_vm2, %v146_v23, -inf }
 0x115   : > { %149 = vmax.xlane.f32.xlu0 %v148_v24 }
 0x117   : > { %v143_v25 = vpop.f32.mrf.mxu0 }
 0x12d   : > { %v214_v37 = vpop.f32.mrf.mxu2 }
 0x12e   : > { %v218_v41 = vmul.f32 0.35355338, %v214_v37 }
 0x130   : > { %v219_v42 = vadd.f32 %v218_v41, %v592_v20 }
 0x132   : > { %v220_v43 = vsel %vm147_vm2, %v219_v42, -inf }
 0x133   : > { %221 = vmax.xlane.f32.xlu2 %v220_v43 }
 0x135   : > { %v216_v40 = vpop.f32.mrf.mxu2 }
 0x147   : > { %v372_v44 = vpop.f32.mrf.mxu0 }
 0x148   : > { %v376_v45 = vmul.f32 0.35355338, %v372_v44 }
 0x14a   : > { %v377_v46 = vadd.f32 %v376_v45, %v592_v20 }
 0x14c   : > { %v378_v48 = vsel %vm147_vm2, %v377_v46, -inf }
 0x14f   : > { %v374_v49 = vpop.f32.mrf.mxu0 }
 0x188   : > { %v150_v34 = vpop.xlane.xlu0 %149 }
 0x189   : > { %v151_v35 = vsub.f32 %v146_v23, %v150_v34 }
 0x18b   : > { %v152_v36 = vmul.f32 1.442695, %v151_v35 }
 0x18d   : > { %519 = vpow2.f32 %v152_v36 }
 0x193   : > { %v520_v38 = vpop.eup %519 }
 0x194   : > { %v154_v39 = vsel %vm147_vm2, %v520_v38, 0.0 }
 0x195   : > { %155 = vadd.xlane.f32.xlu1 %v154_v39 }
 0x19d   : > { %379 = vmax.xlane.f32.xlu1 %v378_v48 }
 0x1a6   : > { %v222_v57 = vpop.xlane.xlu2 %221 }
 0x1a7   : > { %v223_v58 = vsub.f32 %v219_v42, %v222_v57 }
 0x1a9   : > { %v224_v59 = vmul.f32 1.442695, %v223_v58 }
 0x1b6   : > { %235 = vrot.lane.b32.xlu1 %v585_v7, %s552_s20 }
 0x1be   : > { %393 = vrot.lane.b32.xlu1 %v391_v55, %s553_s24 }
 0x208   : > { %v156_v47 = vpop.xlane.xlu1 %155 }
 0x209   : > { %521 = vrcp.f32 %v156_v47 }
 0x20a   : > { %523 = vpow2.f32 %v224_v59 }
 0x20f   : > { %v522_v50 = vpop.eup %521 }
 0x210   : > { %v158_v51 = vmul.f32 %v522_v50, %v520_v38  ;;  %v380_v61 = vpop.xlane.xlu1 %379  ;;  %v524_v4 = vpop.eup %523 }
 0x211   : > { %v381_v0 = vsub.f32 %v377_v46, %v380_v61  ;;  %v226_v5 = vsel %vm147_vm2, %v524_v4, 0.0 }
 0x212   : > { %v159_v52 = vpack.c.bf16 %v158_v51, %v158_v51 }
 0x213   : > { %v382_v2 = vmul.f32 1.442695, %v381_v0 }
 0x214   : > { %487 = vmatmul.msk.bf16.vlgmr.msra.gmra.mxu1 %vm165_vm4, %v159_v52 }
 0x215   : > { %525 = vpow2.f32 %v382_v2 }
 0x21b   : > { %v526_v6 = vpop.eup %525 }
 0x21c   : > { %v384_v7 = vsel %vm147_vm2, %v526_v6, 0.0 }
 0x224   : > { %490 = vmatmul.msk.bf16.vlgmr.msrb.gmra.mxu1 %vm126_vm0, %v272_v32 }
 0x228   : > { %v236_v8 = vpop.permute.xlu1 %235 }
 0x229   : > { %v241_v9 = vsel %vm169_vm3, %v236_v8, 0 }
 0x22a   : > { %250 = vmatpush.bf16.msra.mxu3 %v241_v9 }
 0x230   : > { %v394_v11 = vpop.permute.xlu1 %393 }
 0x231   : > { %v399_v12 = vsel %vm169_vm3, %v394_v11, 0 }
 0x232   : > { %408 = vmatpush.bf16.msrb.mxu2 %v399_v12 }
 0x291   : > { %v182_v53 = vpop.f32.mrf.mxu1 }
 0x292   : > { %v186_v54 = vpack.c.bf16 %v182_v53, %v182_v53 }
 0x294   : > { %188 = vst.msk [vmem:[%s613_s23] sm:$0x3] %vm187_vm5, %v186_v54 }
 0x299   : > { %v184_v56 = vpop.f32.mrf.mxu1 }
 0x2a1   : > { %v293_v60 = vpop.f32.mrf.mxu1 }
 0x2a2   : > { %v297_v62 = vmul.f32 0.35355338, %v293_v60 }
 0x2a4   : > { %v298_v63 = vadd.f32 %v297_v62, %v592_v20 }
 0x2a6   : > { %v299_v1 = vsel %vm147_vm2, %v298_v63, -inf }
 0x2a7   : > { %300 = vmax.xlane.f32.xlu0 %v299_v1 }
 0x2a9   : > { %v295_v3 = vpop.f32.mrf.mxu1 }
 0x2af   : > { %227 = vadd.xlane.f32.xlu0 %v226_v5 }
 0x2b7   : > { %385 = vadd.xlane.f32.xlu0 %v384_v7 }
 0x31a   : > { %v301_v13 = vpop.xlane.xlu0 %300 }
 0x31b   : > { %v302_v14 = vsub.f32 %v298_v63, %v301_v13 }
 0x31d   : > { %v303_v15 = vmul.f32 1.442695, %v302_v14 }
 0x31f   : > { %527 = vpow2.f32 %v303_v15 }
 0x322   : > { %v228_v16 = vpop.xlane.xlu0 %227 }
 0x323   : > { %529 = vrcp.f32 %v228_v16 }
 0x325   : > { %v528_v17 = vpop.eup %527 }
 0x326   : > { %v305_v18 = vsel %vm147_vm2, %v528_v17, 0.0 }
 0x327   : > { %306 = vadd.xlane.f32.xlu0 %v305_v18 }
 0x329   : > { %v530_v19 = vpop.eup %529 }
 0x32a   : > { %v386_v20 = vpop.xlane.xlu0 %385  ;;  %v230_v21 = vmul.f32 %v530_v19, %v524_v4 }
 0x32b   : > { %531 = vrcp.f32 %v386_v20 }
 0x32c   : > { %v231_v22 = vpack.c.bf16 %v230_v21, %v230_v21 }
 0x32e   : > { %489 = vmatmul.msk.bf16.vlgmr.msra.gmra.mxu3 %vm165_vm4, %v231_v22 }
 0x331   : > { %v532_v23 = vpop.eup %531 }
 0x332   : > { %v388_v24 = vmul.f32 %v532_v23, %v526_v6 }
 0x334   : > { %v389_v25 = vpack.c.bf16 %v388_v24, %v388_v24 }
 0x336   : > { %493 = vmatmul.msk.bf16.vlgmr.msrb.gmra.mxu2 %vm165_vm4, %v389_v25 }
 0x33b   : > { %314 = vrot.lane.b32.xlu0 %v588_v10, %s554_s25 }
 0x39a   : > { %v307_v26 = vpop.xlane.xlu0 %306 }
 0x39b   : > { %533 = vrcp.f32 %v307_v26 }
 0x3a1   : > { %v534_v27 = vpop.eup %533 }
 0x3a2   : > { %v309_v28 = vmul.f32 %v534_v27, %v528_v17 }
 0x3a4   : > { %v310_v31 = vpack.c.bf16 %v309_v28, %v309_v28 }
 0x3ad   : > { %v315_v29 = vpop.permute.xlu0 %314 }
 0x3ae   : > { %v320_v30 = vsel %vm169_vm3, %v315_v29, 0 }
 0x3af   : > { %329 = vmatpush.bf16.msrb.mxu3 %v320_v30 }
 0x3b1   : > { %v252_v32 = vpop.f32.mrf.mxu3 }
 0x3b2   : > { %v256_v33 = vpack.c.bf16 %v252_v32, %v252_v32  ;;  %491 = vmatmul.msk.bf16.vlgmr.msrb.gmra.mxu3 %vm165_vm4, %v310_v31 }
 0x3b4   : > { %v258_v34 = vrot.slane %v256_v33, 2 }
 0x3b6   : > { %v261_v35 = vsel %vm169_vm3, %v256_v33, %v258_v34 }
 0x3b7   : > { %263 = vrot.lane.b32.xlu2 %v261_v35, %s555_s26 }
 0x3b9   : > { %v254_v10 = vpop.f32.mrf.mxu3  ;;  %v410_v36 = vpop.f32.mrf.mxu2 }
 0x3ba   : > { %v414_v42 = vpack.c.bf16 %v410_v36, %v410_v36 }
 0x3bc   : > { %v416_v45 = vrot.slane %v414_v42, 2 }
 0x3be   : > { %v419_v46 = vsel %vm169_vm3, %v414_v42, %v416_v45 }
 0x3c1   : > { %v412_v37 = vpop.f32.mrf.mxu2 }
 0x411   : > { %v264_v38 = vpop.permute.xlu2 %263 }
 0x412   : > { %267 = vst.msk [vmem:[%s613_s23] sm:$0x3] %vm266_vm6, %v264_v38 }
 0x435   : > { %v331_v39 = vpop.f32.mrf.mxu3 }
 0x436   : > { %v335_v40 = vpack.c.bf16 %v331_v39, %v331_v39 }
 0x438   : > { %v337_v41 = vrot.slane %v335_v40, 2 }
 0x43a   : > { %v340_v43 = vsel %vm169_vm3, %v335_v40, %v337_v41 }
 0x43b   : > { %342 = vrot.lane.b32.xlu1 %v340_v43, %s556_s27 }
 0x43d   : > { %v333_v44 = vpop.f32.mrf.mxu3 }
 0x443   : > { %421 = vrot.lane.b32.xlu1 %v419_v46, %s557_s28 }
 0x4ad   : > { %v343_v47 = vpop.permute.xlu1 %342 }
 0x4ae   : > { %346 = vst.msk [vmem:[%s613_s23] sm:$0x3] %vm345_vm7, %v343_v47 }
 0x4b5   : > { %v422_v48 = vpop.permute.xlu1 %421 }
 0x4b6   : > { %425 = vst.msk [vmem:[%s613_s23] sm:$0x3] %vm424_vm8, %v422_v48 }
 0x4b7 PF: > { %s11_s6 = sadd.s32 1, %s541_s6  }
 0x4b8   : > { %p8_p4 = scmp.ge.s32.totalorder %s11_s6, 4  }
 0x4ba   :  { %10 = sbr.rel (!%p8_p4) target bundleno = 1 (0x1), region = 54 }

// kernel: model_forward.18
= control target key start
LH: loop header
LB: loop body
LE: loop exit
PB: predicated region body
PF: predicated region fallthrough
CT: control target
= control target key end

     0   :  { %10 = vsyncpa [#allocation3], 0  ;;  %s316_s0 = inlined_call_operand.vmem [shape: bf16[8,32], index: 0, kind: input, shape index: {}]   ;;  %s317_s1 = inlined_call_operand.vmem [shape: bf16[32,128], index: 1, kind: input, shape index: {}]   ;;  %s318_s2 = inlined_call_operand.hbm [shape: f32[1,32], index: 2, kind: input, shape index: {}]   ;;  %s319_s3 = inlined_call_operand.hbm [shape: f32[1,32], index: 3, kind: input, shape index: {}]   ;;  %s320_s4 = inlined_call_operand.hbm [shape: f32[1,128], index: 4, kind: input, shape index: {}]   ;;  %s321_s5 = inlined_call_operand.vmem [shape: bf16[8,128], index: 5, kind: output, shape index: {}]  }
   0x1   :  { %11 = vsyncpa [#allocation5], 0  ;;  %s32_s20 = sshll.u32 %s319_s3, 4  ;;  %s258_s21 = smov [#allocation4]   ;;  %s33_s20 = int_to_ptr.hbm [resolvable:$true] %s32_s20 }
   0x2   :  { %s34_s22 = sshll.u32 %s258_s21, 4  ;;  %s21_s25 = sshll.u32 %s318_s2, 4  ;;  %s35_s22 = int_to_ptr.vmem [resolvable:$true] %s34_s22  ;;  %s22_s25 = int_to_ptr.hbm [resolvable:$true] %s21_s25 }
   0x3   :  { %37 = dma.hbm_to_vmem [thread:$0]  %s33_s20, 16, %s35_s22, [#allocation5]  }
   0x4   :  { %s259_s26 = smov [#allocation2]   ;;  %s43_s30 = sshll.u32 %s320_s4, 4  ;;  %s44_s30 = int_to_ptr.hbm [resolvable:$true] %s43_s30 }
   0x5   :  { %s23_s27 = sshll.u32 %s259_s26, 4  ;;  %s260_s3 = smov [#allocation6]   ;;  %s24_s27 = int_to_ptr.vmem [resolvable:$true] %s23_s27 }
   0x6   :  { %26 = dma.hbm_to_vmem [thread:$0]  %s22_s25, 16, %s24_s27, [#allocation3]  }
   0x7   :  { %s45_s6 = sshll.u32 %s260_s3, 4  ;;  %s46_s6 = int_to_ptr.vmem [resolvable:$true] %s45_s6 }
   0x8   :  { %48 = dma.hbm_to_vmem [thread:$0]  %s44_s30, 16, %s46_s6, [#allocation5]  }
   0x9   :  { %254 = dma.done.wait [#allocation3], 16  }
   0xa   :  { %255 = vsyncadd [#allocation3], 4294967280 }
   0xb   :  { %256 = dma.done.wait [#allocation5], 32  }
   0xc   :  { %257 = vsyncadd [#allocation5], 4294967264  ;;  %vm64_vm0 = vcmask 261120   ;;  %v62_v0 = vld [vmem:[%s316_s0] sm:$0xf]  ;;  %v261_v3 = vmov 32.0  }
   0xd   :  { %v63_v1 = vunpack.c.l.bf16 %v62_v0  ;;  %176 = vrcp.f32 %v261_v3  ;;  %v168_v15 = vld [vmem:[%s317_s1 + $0x8] sm:$0xff]  ;;  %v167_v16 = vld [vmem:[%s317_s1] sm:$0xff] }
   0xe   :  { %134 = vmatpush.bf16.msra.mxu0 %v168_v15  ;;  %v173_v26 = vld [vmem:[#allocation2] ss:$0 sm:$0xff]  ;;  %v174_v29 = vld [vmem:[#allocation4] ss:$0 sm:$0xff]  ;;  %v175_v33 = vld [vmem:[#allocation6] ss:$0 sm:$0xff] }
   0xf   :  { %v65_v2 = vsel %vm64_vm0, %v63_v1, 0.0 }
  0x10   :  { %66 = vadd.xlane.f32.xlu0 %v65_v2 }
  0x12   :  { %135 = vmatpush.bf16.msra.mxu0 %v167_v16 }
  0x13   :  { %v177_v4 = vpop.eup %176 }
  0x14   :  { %v69_v5 = vmul.f32 32.0, %v177_v4  ;;  %vm73_vm1 = vweird.f32 %v177_v4 }
  0x16   :  { %v70_v6 = vsub.f32 1.0, %v69_v5 }
  0x18   :  { %v71_v7 = vmul.f32 %v177_v4, %v70_v6 }
  0x1a   :  { %v72_v8 = vadd.f32 %v177_v4, %v71_v7 }
  0x1c   :  { %v74_v9 = vsel %vm73_vm1, %v177_v4, %v72_v8 }
  0x83   :  { %v67_v10 = vpop.xlane.xlu0 %66 }
  0x84   :  { %v75_v11 = vmul.f32 %v74_v9, %v67_v10 }
  0x86   :  { %v76_v12 = vsub.f32 %v63_v1, %v75_v11 }
  0x88   :  { %v77_v13 = vmul.f32 %v76_v12, %v76_v12 }
  0x8a   :  { %v78_v14 = vsel %vm64_vm0, %v77_v13, 0.0 }
  0x8b   :  { %79 = vadd.xlane.f32.xlu0 %v78_v14 }
  0xfe   :  { %v80_v17 = vpop.xlane.xlu0 %79 }
  0xff   :  { %v81_v18 = vmul.f32 %v80_v17, %v74_v9 }
 0x101   :  { %v82_v19 = vadd.f32 1e-05, %v81_v18 }
 0x103   :  { %178 = vrsqrt.f32 %v82_v19  ;;  %vm89_vm3 = vweird.f32 %v82_v19 }
 0x109   :  { %v179_v20 = vpop.eup %178 }
 0x10a   :  { %v84_v21 = vmul.f32 %v179_v20, %v82_v19  ;;  %vm90_vm2 = vweird.f32 %v179_v20 }
 0x10b   :  { %vm91_vm4 = vmor %vm89_vm3, %vm90_vm2 }
 0x10c   :  { %v85_v22 = vmul.f32 %v179_v20, %v84_v21 }
 0x10e   :  { %v86_v23 = vmul.f32 0.5, %v85_v22 }
 0x110   :  { %v87_v24 = vsub.f32 1.5, %v86_v23 }
 0x112   :  { %v88_v25 = vmul.f32 %v179_v20, %v87_v24 }
 0x114   :  { %v92_v27 = vsel %vm91_vm4, %v179_v20, %v88_v25 }
 0x115   :  { %v93_v28 = vmul.f32 %v92_v27, %v76_v12 }
 0x117   :  { %v98_v30 = vmul.f32 %v173_v26, %v93_v28 }
 0x119   :  { %v103_v31 = vadd.f32 %v174_v29, %v98_v30 }
 0x11b   :  { %v104_v32 = vpack.c.bf16 %v103_v31, %v103_v31 }
 0x11d   :  { %166 = vmatmul.msk.bf16.vlgmr.msra.gmra.mxu0 %vm64_vm0, %v104_v32 }
 0x19a   :  { %v137_v34 = vpop.f32.mrf.mxu0 }
 0x19b   :  { %v138_v35 = vadd.f32 %v175_v33, %v137_v34 }
 0x19d   :  { %v142_v36 = vmul.f32 0.044715, %v138_v35  ;;  %v141_v43 = vmul.f32 0.5, %v138_v35 }
 0x19f   :  { %v143_v37 = vmul.f32 %v142_v36, %v138_v35 }
 0x1a1   :  { %v144_v38 = vmul.f32 %v143_v37, %v138_v35 }
 0x1a2   :  { %v139_v39 = vpop.f32.mrf.mxu0 }
 0x1a3   :  { %v145_v40 = vadd.f32 %v144_v38, %v138_v35 }
 0x1a5   :  { %v146_v41 = vmul.f32 0.7978846, %v145_v40 }
 0x1a7   :  { %180 = vtanh.f32 %v146_v41 }
 0x1ad   :  { %v181_v42 = vpop.eup %180 }
 0x1ae   :  { %v148_v44 = vadd.f32 1.0, %v181_v42 }
 0x1b0   :  { %v149_v45 = vmul.f32 %v148_v44, %v141_v43 }
 0x1b2   :  { %v150_v46 = vpack.c.bf16 %v149_v45, %v149_v45 }
 0x1b4   :  { %151 = vst [vmem:[%s321_s5] sm:$0xf] %v150_v46 }
 0x1b5   :  { %156 = vsyncpa [#allocation3], 1 }
 0x1b6   :  { %157 = vsyncpa [#allocation5], 1 }

// kernel: model_forward.19
= control target key start
LH: loop header
LB: loop body
LE: loop exit
PB: predicated region body
PF: predicated region fallthrough
CT: control target
= control target key end

     0   :  { %vm103_vm0 = vcmask 257024   ;;  %s211_s1 = inlined_call_operand.vmem [shape: bf16[128,32], index: 1, kind: input, shape index: {}]   ;;  %s212_s2 = inlined_call_operand.vmem [shape: f32[1,32], index: 2, kind: input, shape index: {}]   ;;  %s213_s0 = inlined_call_operand.vmem [shape: bf16[8,128], index: 0, kind: input, shape index: {}]   ;;  %s214_s3 = inlined_call_operand.vmem [shape: bf16[8,32], index: 3, kind: input, shape index: {}]   ;;  %s215_s4 = inlined_call_operand.vmem [shape: bf16[8,32], index: 4, kind: output, shape index: {}]  }
   0x1   :  { %v148_v0 = vld [vmem:[%s211_s1 + $0x38] sm:$0xff]  ;;  %v147_v1 = vld [vmem:[%s211_s1 + $0x30] sm:$0xff]  ;;  %v146_v2 = vld [vmem:[%s211_s1 + $0x28] sm:$0xff] }
   0x2   :  { %86 = vmatpush.bf16.msra.mxu0 %v148_v0  ;;  %v145_v3 = vld [vmem:[%s211_s1 + $0x20] sm:$0xff]  ;;  %v144_v4 = vld [vmem:[%s211_s1 + $0x18] sm:$0xff]  ;;  %v143_v5 = vld [vmem:[%s211_s1 + $0x10] sm:$0xff] }
   0x3   :  { %v142_v6 = vld [vmem:[%s211_s1 + $0x8] sm:$0xff]  ;;  %v141_v7 = vld [vmem:[%s211_s1] sm:$0xff] }
   0x4   :  { %v17_v8 = vld [vmem:[%s213_s0] sm:$0xf] }
   0x5   :  { %v99_v9 = vld [vmem:[%s214_s3] sm:$0xf] }
   0x6   :  { %87 = vmatpush.bf16.msra.mxu0 %v147_v1  ;;  %v149_v10 = vld [vmem:[%s212_s2] ss:$0 sm:$0xff]  ;;  %v100_v11 = vunpack.c.l.bf16 %v99_v9 }
   0xa   :  { %88 = vmatpush.bf16.msra.mxu0 %v146_v2 }
   0xe   :  { %89 = vmatpush.bf16.msra.mxu0 %v145_v3 }
  0x12   :  { %90 = vmatpush.bf16.msra.mxu0 %v144_v4 }
  0x16   :  { %91 = vmatpush.bf16.msra.mxu0 %v143_v5 }
  0x1a   :  { %92 = vmatpush.bf16.msra.mxu0 %v142_v6 }
  0x1e   :  { %93 = vmatpush.bf16.msra.mxu0 %v141_v7 }
  0x21   :  { %94 = vmatmul.bf16.vlgmr.msra.gmra.mxu0 %v17_v8 }
  0x9e   :  { %v95_v12 = vpop.f32.mrf.mxu0 }
  0x9f   :  { %v96_v13 = vadd.f32 %v149_v10, %v95_v12 }
  0xa1   :  { %v101_v14 = vadd.f32 %v100_v11, %v96_v13 }
  0xa3   :  { %v102_v15 = vpack.c.bf16 %v101_v14, %v101_v14 }
  0xa5   :  { %104 = vst.msk [vmem:[%s215_s4] sm:$0xf] %vm103_vm0, %v102_v15 }
  0xa6   :  { %v97_v16 = vpop.f32.mrf.mxu0 }

// kernel: squeeze.0
= control target key start
LH: loop header
LB: loop body
LE: loop exit
PB: predicated region body
PF: predicated region fallthrough
CT: control target
= control target key end

     0   :  { %s34_s8 = smov 125   ;;  %s35_s9 = smov 126   ;;  %vm7_vm0 = vcmask 7168   ;;  %s61_s0 = inlined_call_operand.vmem [shape: f32[2,4], index: 0, kind: input, shape index: {}]   ;;  %s62_s1 = inlined_call_operand.vmem [shape: f32[8,1], index: 1, kind: output, shape index: {}]  }
   0x1   :  { %v4_v0 = vld [vmem:[%s61_s0] sm:$0x3]  ;;  %s33_s0 = smov 127  }
   0x2   :  { %5 = vst [vmem:[#allocation0] sm:$0x3] %v4_v0 }
   0x9   :  { %v9_v1 = vld [vmem:[#allocation0] sm:$0x3]  }
   0xa   :  { %v21_v2 = vld [vmem:[#allocation0] sm:$0x3]   ;;  %10 = vrot.lane.b32.xlu0 %v9_v1, %s33_s0 }
   0xb   :  { %22 = vrot.lane.b32.xlu1 %v21_v2, %s34_s8  ;;  %v15_v3 = vld [vmem:[#allocation0] sm:$0x3]  }
   0xc   :  { %v6_v4 = vld [vmem:[#allocation0] sm:$0x3]  }
   0xd   :  { %8 = vst.msk [vmem:[%s62_s1] ss:$4 sm:$0x3] %vm7_vm0, %v6_v4  }
  0x12   :  { %16 = vrot.lane.b32.xlu0 %v15_v3, %s35_s9 }
  0x7c   :  { %v11_v5 = vpop.permute.xlu0 %10  }
  0x7d   :  { %v23_v6 = vpop.permute.xlu1 %22   ;;  %27 = vst.msk [vmem:[%s62_s1 + $0x1] ss:$4 sm:$0x3] %vm7_vm0, %v11_v5  }
  0x7e   :  { %29 = vst.msk [vmem:[%s62_s1 + $0x3] ss:$4 sm:$0x3] %vm7_vm0, %v23_v6  }
  0x84   :  { %v17_v7 = vpop.permute.xlu0 %16  }
  0x85   :  { %28 = vst.msk [vmem:[%s62_s1 + $0x2] ss:$4 sm:$0x3] %vm7_vm0, %v17_v7  }

// kernel: model_forward.23
= control target key start
LH: loop header
LB: loop body
LE: loop exit
PB: predicated region body
PF: predicated region fallthrough
CT: control target
= control target key end

     0   :  { %vm23_vm0 = vcmask 261120   ;;  %v136_v3 = vmov 32.0   ;;  %s191_s0 = inlined_call_operand.vmem [shape: bf16[8,32], index: 0, kind: input, shape index: {}]   ;;  %s192_s2 = inlined_call_operand.vmem [shape: f32[1,32], index: 2, kind: input, shape index: {}]   ;;  %s193_s3 = inlined_call_operand.vmem [shape: f32[1,32], index: 3, kind: input, shape index: {}]   ;;  %s194_s4 = inlined_call_operand.vmem [shape: f32[1,128], index: 4, kind: input, shape index: {}]   ;;  %s195_s1 = inlined_call_operand.vmem [shape: bf16[32,128], index: 1, kind: input, shape index: {}]   ;;  %s196_s5 = inlined_call_operand.vmem [shape: bf16[8,128], index: 5, kind: output, shape index: {}]  }
   0x1   :  { %v21_v0 = vld [vmem:[%s191_s0] sm:$0xf]  ;;  %130 = vrcp.f32 %v136_v3  ;;  %v125_v15 = vld [vmem:[%s195_s1 + $0x8] sm:$0xff] }
   0x2   :  { %v22_v1 = vunpack.c.l.bf16 %v21_v0  ;;  %93 = vmatpush.bf16.msra.mxu0 %v125_v15  ;;  %v124_v16 = vld [vmem:[%s195_s1] sm:$0xff] }
   0x3   :  { %v127_v26 = vld [vmem:[%s192_s2] ss:$0 sm:$0xff] }
   0x4   :  { %v24_v2 = vsel %vm23_vm0, %v22_v1, 0.0  ;;  %v128_v29 = vld [vmem:[%s193_s3] ss:$0 sm:$0xff] }
   0x5   :  { %25 = vadd.xlane.f32.xlu0 %v24_v2  ;;  %v129_v33 = vld [vmem:[%s194_s4] ss:$0 sm:$0xff] }
   0x6   :  { %94 = vmatpush.bf16.msra.mxu0 %v124_v16 }
   0x7   :  { %v131_v4 = vpop.eup %130 }
   0x8   :  { %v28_v5 = vmul.f32 32.0, %v131_v4  ;;  %vm32_vm1 = vweird.f32 %v131_v4 }
   0xa   :  { %v29_v6 = vsub.f32 1.0, %v28_v5 }
   0xc   :  { %v30_v7 = vmul.f32 %v131_v4, %v29_v6 }
   0xe   :  { %v31_v8 = vadd.f32 %v131_v4, %v30_v7 }
  0x10   :  { %v33_v9 = vsel %vm32_vm1, %v131_v4, %v31_v8 }
  0x78   :  { %v26_v10 = vpop.xlane.xlu0 %25 }
  0x79   :  { %v34_v11 = vmul.f32 %v33_v9, %v26_v10 }
  0x7b   :  { %v35_v12 = vsub.f32 %v22_v1, %v34_v11 }
  0x7d   :  { %v36_v13 = vmul.f32 %v35_v12, %v35_v12 }
  0x7f   :  { %v37_v14 = vsel %vm23_vm0, %v36_v13, 0.0 }
  0x80   :  { %38 = vadd.xlane.f32.xlu0 %v37_v14 }
  0xf3   :  { %v39_v17 = vpop.xlane.xlu0 %38 }
  0xf4   :  { %v40_v18 = vmul.f32 %v39_v17, %v33_v9 }
  0xf6   :  { %v41_v19 = vadd.f32 1e-05, %v40_v18 }
  0xf8   :  { %132 = vrsqrt.f32 %v41_v19  ;;  %vm48_vm3 = vweird.f32 %v41_v19 }
  0xfe   :  { %v133_v20 = vpop.eup %132 }
  0xff   :  { %v43_v21 = vmul.f32 %v133_v20, %v41_v19  ;;  %vm49_vm2 = vweird.f32 %v133_v20 }
 0x100   :  { %vm50_vm4 = vmor %vm48_vm3, %vm49_vm2 }
 0x101   :  { %v44_v22 = vmul.f32 %v133_v20, %v43_v21 }
 0x103   :  { %v45_v23 = vmul.f32 0.5, %v44_v22 }
 0x105   :  { %v46_v24 = vsub.f32 1.5, %v45_v23 }
 0x107   :  { %v47_v25 = vmul.f32 %v133_v20, %v46_v24 }
 0x109   :  { %v51_v27 = vsel %vm50_vm4, %v133_v20, %v47_v25 }
 0x10a   :  { %v52_v28 = vmul.f32 %v51_v27, %v35_v12 }
 0x10c   :  { %v57_v30 = vmul.f32 %v127_v26, %v52_v28 }
 0x10e   :  { %v62_v31 = vadd.f32 %v128_v29, %v57_v30 }
 0x110   :  { %v63_v32 = vpack.c.bf16 %v62_v31, %v62_v31 }
 0x112   :  { %123 = vmatmul.msk.bf16.vlgmr.msra.gmra.mxu0 %vm23_vm0, %v63_v32 }
 0x18f   :  { %v96_v34 = vpop.f32.mrf.mxu0 }
 0x190   :  { %v97_v35 = vadd.f32 %v129_v33, %v96_v34 }
 0x192   :  { %v101_v36 = vmul.f32 0.044715, %v97_v35  ;;  %v100_v43 = vmul.f32 0.5, %v97_v35 }
 0x194   :  { %v102_v37 = vmul.f32 %v101_v36, %v97_v35 }
 0x196   :  { %v103_v38 = vmul.f32 %v102_v37, %v97_v35 }
 0x197   :  { %v98_v39 = vpop.f32.mrf.mxu0 }
 0x198   :  { %v104_v40 = vadd.f32 %v103_v38, %v97_v35 }
 0x19a   :  { %v105_v41 = vmul.f32 0.7978846, %v104_v40 }
 0x19c   :  { %134 = vtanh.f32 %v105_v41 }
 0x1a2   :  { %v135_v42 = vpop.eup %134 }
 0x1a3   :  { %v107_v44 = vadd.f32 1.0, %v135_v42 }
 0x1a5   :  { %v108_v45 = vmul.f32 %v107_v44, %v100_v43 }
 0x1a7   :  { %v109_v46 = vpack.c.bf16 %v108_v45, %v108_v45 }
 0x1a9   :  { %110 = vst [vmem:[%s196_s5] sm:$0xf] %v109_v46 }

// kernel: model_forward.25
= control target key start
LH: loop header
LB: loop body
LE: loop exit
PB: predicated region body
PF: predicated region fallthrough
CT: control target
= control target key end

     0   :  { %vm16_vm0 = vcmask 261120   ;;  %v70_v3 = vmov 32.0   ;;  %vm57_vm5 = vcmask 257024   ;;  %s105_s0 = inlined_call_operand.vmem [shape: bf16[8,32], index: 0, kind: input, shape index: {}]   ;;  %s106_s1 = inlined_call_operand.vmem [shape: f32[1,32], index: 1, kind: input, shape index: {}]   ;;  %s107_s2 = inlined_call_operand.vmem [shape: f32[1,32], index: 2, kind: input, shape index: {}]   ;;  %s108_s3 = inlined_call_operand.vmem [shape: bf16[8,32], index: 3, kind: output, shape index: {}]  }
   0x1   :  { %v14_v0 = vld [vmem:[%s105_s0] sm:$0xf]  ;;  %66 = vrcp.f32 %v70_v3 }
   0x2   :  { %v15_v1 = vunpack.c.l.bf16 %v14_v0  ;;  %v64_v24 = vld [vmem:[%s106_s1] ss:$0 sm:$0xff] }
   0x3   :  { %v65_v26 = vld [vmem:[%s107_s2] ss:$0 sm:$0xff] }
   0x4   :  { %v17_v2 = vsel %vm16_vm0, %v15_v1, 0.0 }
   0x5   :  { %18 = vadd.xlane.f32.xlu0 %v17_v2 }
   0x7   :  { %v67_v4 = vpop.eup %66 }
   0x8   :  { %v21_v5 = vmul.f32 32.0, %v67_v4  ;;  %vm25_vm1 = vweird.f32 %v67_v4 }
   0xa   :  { %v22_v6 = vsub.f32 1.0, %v21_v5 }
   0xc   :  { %v23_v7 = vmul.f32 %v67_v4, %v22_v6 }
   0xe   :  { %v24_v8 = vadd.f32 %v67_v4, %v23_v7 }
  0x10   :  { %v26_v9 = vsel %vm25_vm1, %v67_v4, %v24_v8 }
  0x78   :  { %v19_v10 = vpop.xlane.xlu0 %18 }
  0x79   :  { %v27_v11 = vmul.f32 %v26_v9, %v19_v10 }
  0x7b   :  { %v28_v12 = vsub.f32 %v15_v1, %v27_v11 }
  0x7d   :  { %v29_v13 = vmul.f32 %v28_v12, %v28_v12 }
  0x7f   :  { %v30_v14 = vsel %vm16_vm0, %v29_v13, 0.0 }
  0x80   :  { %31 = vadd.xlane.f32.xlu0 %v30_v14 }
  0xf3   :  { %v32_v15 = vpop.xlane.xlu0 %31 }
  0xf4   :  { %v33_v16 = vmul.f32 %v32_v15, %v26_v9 }
  0xf6   :  { %v34_v17 = vadd.f32 1e-05, %v33_v16 }
  0xf8   :  { %68 = vrsqrt.f32 %v34_v17  ;;  %vm41_vm3 = vweird.f32 %v34_v17 }
  0xfe   :  { %v69_v18 = vpop.eup %68 }
  0xff   :  { %v36_v19 = vmul.f32 %v69_v18, %v34_v17  ;;  %vm42_vm2 = vweird.f32 %v69_v18 }
 0x100   :  { %vm43_vm4 = vmor %vm41_vm3, %vm42_vm2 }
 0x101   :  { %v37_v20 = vmul.f32 %v69_v18, %v36_v19 }
 0x103   :  { %v38_v21 = vmul.f32 0.5, %v37_v20 }
 0x105   :  { %v39_v22 = vsub.f32 1.5, %v38_v21 }
 0x107   :  { %v40_v23 = vmul.f32 %v69_v18, %v39_v22 }
 0x109   :  { %v44_v25 = vsel %vm43_vm4, %v69_v18, %v40_v23 }
 0x10a   :  { %v45_v27 = vmul.f32 %v44_v25, %v28_v12 }
 0x10c   :  { %v50_v28 = vmul.f32 %v64_v24, %v45_v27 }
 0x10e   :  { %v55_v29 = vadd.f32 %v65_v26, %v50_v28 }
 0x110   :  { %v56_v30 = vpack.c.bf16 %v55_v29, %v55_v29 }
 0x112   :  { %58 = vst.msk [vmem:[%s108_s3] sm:$0xf] %vm57_vm5, %v56_v30 }

// kernel: model_forward.26
= control target key start
LH: loop header
LB: loop body
LE: loop exit
PB: predicated region body
PF: predicated region fallthrough
CT: control target
= control target key end

     0   :  { %s398_s9 = smov 0   ;;  %s400_s10 = smov 0   ;;  %s431_s0 = inlined_call_operand.vmem [shape: bf16[3,8,32], index: 0, kind: input, shape index: {}]   ;;  %s432_s1 = inlined_call_operand.vmem [shape: bf16[3,32,32], index: 1, kind: input, shape index: {}]   ;;  %s433_s2 = inlined_call_operand.vmem [shape: f32[3,8,32], index: 2, kind: output, shape index: {}]  }
   0x1   :  { %s402_s11 = smov 0  }
   0x2 LB: > { %s24_s12 = sadd.s32 1, %s377_s10  ;;  %p316_p0 = scmp.ge.s32.totalorder %s381_s11, 1  ;;  %s381_s11 = sphi %s402_s11, %s12_s11   ;;  %s377_s10 = sphi %s400_s10, %s435_s10   ;;  %s373_s9 = sphi %s398_s9, %s434_s9  }
   0x3   : > { %p26_p1 = scmp.ge.s32.totalorder %s24_s12, 3  ;;  %p140_p2 = scmp.lt.s32.totalorder %s381_s11, 4 }
   0x5   : > { %s437_s12 = smov (%p26_p1, %s24_s12), 0  ;;  %p141_p3 = pnand %p316_p0, %p140_p2 }
   0x6   : > { %p171_p4 = scmp.lt.s32.totalorder (!%p141_p3), %s373_s9, 2 }
   0x7   : > { %144 = sbr.rel (%p141_p3) target bundleno = 157 (0x9d), region = 28 }
   0xc   : > { %s439_s9 = smov (!%p171_p4, %s373_s9), 2  ;;  %vm208_vm0 = vcmask 261120  }
   0xd   : > { %s332_s13 = sshll.u32 %s439_s9, 4  ;;  %s317_s17 = sshll.u32 %s439_s9, 2 }
   0xe   : > { %s182_s16 = scalar_lea.vmem %s432_s1, %s332_s13  ;;  %s177_s20 = scalar_lea.vmem %s431_s0, %s317_s17 }
   0xf   : > { %v334_v0 = vld [vmem:[%s182_s16 + $0x8] sm:$0xff]  ;;  %v333_v1 = vld [vmem:[%s182_s16] sm:$0xff]  ;;  %s320_s21 = sshll.u32 %s439_s9, 3 }
  0x10   : > { %218 = vmatpush.bf16.msra.mxu0 %v334_v0  ;;  %v191_v2 = vld [vmem:[%s177_s20] sm:$0xf]  ;;  %s189_s24 = scalar_lea.vmem %s433_s2, %s320_s21 }
  0x14   : > { %219 = vmatpush.bf16.msra.mxu0 %v333_v1 }
  0x17   : > { %329 = vmatmul.msk.bf16.vlgmr.msra.gmra.mxu0 %vm208_vm0, %v191_v2 }
  0x94   : > { %v221_v3 = vpop.f32.mrf.mxu0 }
  0x95   : > { %225 = vst.msk [vmem:[%s189_s24] sm:$0xff] %vm208_vm0, %v221_v3 }
  0x9c   : > { %v223_v4 = vpop.f32.mrf.mxu0 }
  0x9d PF: > { %s12_s11 = sadd.s32 1, %s381_s11   ;;  %s434_s9 = smov %s377_s10 }
  0x9e   : > { %p9_p5 = scmp.ge.s32.totalorder %s12_s11, 5   ;;  %s435_s10 = smov %s437_s12 }
  0xa0   :  { %11 = sbr.rel (!%p9_p5) target bundleno = 2 (0x2), region = 61 }

// kernel: model_forward.27
= control target key start
LH: loop header
LB: loop body
LE: loop exit
PB: predicated region body
PF: predicated region fallthrough
CT: control target
= control target key end

     0   :  { %v141_v2 = vmov 0   ;;  %s202_s0 = inlined_call_operand.vmem [shape: bf16[8,32], index: 0, kind: input, shape index: {}]   ;;  %s203_s1 = inlined_call_operand.vmem [shape: bf16[8,32], index: 1, kind: input, shape index: {}]   ;;  %s204_s2 = inlined_call_operand.vmem [shape: bf16[32,8], index: 2, kind: input, shape index: {}]   ;;  %s205_s3 = inlined_call_operand.vmem [shape: f32[1,8], index: 3, kind: input, shape index: {}]   ;;  %s206_s4 = inlined_call_operand.vmem [shape: f32[8,1], index: 4, kind: input, shape index: {}]   ;;  %s207_s5 = inlined_call_operand.vmem [shape: f32[8,1], index: 5, kind: input, shape index: {}]   ;;  %s208_s6 = inlined_call_operand.hbm [shape: f32[8,8], index: 6, kind: output, shape index: {}]  }
   0x1   :  { %v110_v0 = vld [vmem:[%s204_s2 + $0x8] sm:$0xff]  ;;  %v68_v1 = vld [vmem:[%s206_s4] sm:$0xff]  ;;  %113 = vset.pattern.permute.xlu0 %v141_v2 }
   0x2   :  { %v25_v3 = vld [vmem:[%s202_s0] sm:$0xf]  ;;  %61 = vmatpush.bf16.msra.mxu0 %v110_v0  ;;  %71 = vperm.xlu0 %113, %v68_v1  }
   0x3   :  { %v27_v4 = vld [vmem:[%s203_s1] sm:$0xf]  ;;  %v26_v6 = vunpack.c.l.bf16 %v25_v3 }
   0x4   :  { %v109_v5 = vld [vmem:[%s204_s2] sm:$0xff]  ;;  %v28_v7 = vunpack.c.l.bf16 %v27_v4 }
   0x5   :  { %11 = vsyncpa [#allocation3], 0  ;;  %vm51_vm0 = vcmask 261120   ;;  %v75_v10 = vld [vmem:[%s207_s5] sm:$0xff]  ;;  %s142_s2 = smov [#allocation2]   ;;  %s91_s11 = sshll.u32 %s208_s6, 4  ;;  %s92_s11 = int_to_ptr.hbm [resolvable:$true] %s91_s11 }
   0x6   :  { %v29_v8 = vadd.f32 %v28_v7, %v26_v6  ;;  %62 = vmatpush.bf16.msra.mxu0 %v109_v5  ;;  %v114_v12 = vld [vmem:[%s205_s3] ss:$0 sm:$0xff]  ;;  %s89_s8 = sshll.u32 %s142_s2, 4  ;;  %vm82_vm1 = vcmask 64512   ;;  %s90_s8 = int_to_ptr.vmem [resolvable:$true] %s89_s8 }
   0x8   :  { %v30_v9 = vpack.c.bf16 %v29_v8, %v29_v8 }
   0xa   :  { %108 = vmatmul.msk.bf16.vlgmr.msra.gmra.mxu0 %vm51_vm0, %v30_v9  ;;  %78 = vperm.xlu0 %113, %v75_v10  }
  0x74   :  { %v72_v11 = vpop.permute.xlu0 %71 }
  0x7c   :  { %v79_v16 = vpop.permute.xlu0 %78 }
  0x87   :  { %v64_v13 = vpop.f32.mrf.mxu0 }
  0x88   :  { %v65_v14 = vadd.f32 %v114_v12, %v64_v13 }
  0x8a   :  { %v74_v15 = vmul.f32 %v72_v11, %v65_v14 }
  0x8c   :  { %v81_v17 = vadd.f32 %v79_v16, %v74_v15 }
  0x8e   :  { %83 = vst.msk [vmem:[#allocation2] sm:$0xff] %vm82_vm1, %v81_v17 }
  0x8f   :  { %v66_v18 = vpop.f32.mrf.mxu0  ;;  %94 = dma.vmem_to_hbm [thread:$0]  %s90_s8, 128, %s92_s11, [#allocation3]  }
  0x90   :  { %139 = dma.done.wait [#allocation3], 128  }
  0x91   :  { %140 = vsyncadd [#allocation3], 4294967168 }
  0x92   :  { %99 = vsyncpa [#allocation3], 1 }

</bundles_post_ra>
